<compile_context>
chip_gen: v6e
topology: v6e:2x2x1
jax: 0.10.0
libtpu: 0.0.40
codegen_flags: <defaults>
</compile_context>

<pallas_src>
import functools

import jax
import jax.numpy as jnp
import numpy as np
from jax import lax
from jax.experimental import pallas as pl
from jax.experimental.pallas import tpu as pltpu


def _mha_kernel(q_ref, k_ref, v_ref, vm_ref,
                wq_ref, wk_ref, wv_ref, bq_ref, bk_ref, bv_ref,
                wo_ref, bo_ref, lnw_ref, lnb_ref,
                out_ref, ctx_ref,
                *, b_blk, seq, nhead, d_k, d_v, nhid, gamma, residual, eps,
                mxu_dtype):
    f32 = jnp.float32
    mm = mxu_dtype

    q_in = q_ref[...]                       # (b_blk*seq, nhid) f32 row slab
    k_in = k_ref[...]
    v_in = v_ref[...]

    # Dense Q/K/V projections on the whole row slab: one MXU push each,
    # bf16 operands (default) with f32 accumulation.
    q_proj = jnp.dot(q_in.astype(mm), wq_ref[...].astype(mm),
                     preferred_element_type=f32) + bq_ref[...]
    k_proj = jnp.dot(k_in.astype(mm), wk_ref[...].astype(mm),
                     preferred_element_type=f32) + bk_ref[...]
    v_proj = jnp.dot(v_in.astype(mm), wv_ref[...].astype(mm),
                     preferred_element_type=f32) + bv_ref[...]

    scale = 1.0 / np.sqrt(d_k)
    one_m_gamma = 1.0 - gamma

    # Per-(batch, head) attention on small static 2-D tiles (no relayouts).
    # The tiny depth-d_k score/context pushes are inherent to these shapes;
    # the expensive part (output projection) is fused across heads below.
    for b in range(b_blk):
        r0 = b * seq
        vm_b = vm_ref[b] * one_m_gamma                      # (S, S), hoisted
        for h in range(nhead):
            qc = h * d_k
            vc = h * d_v
            q_bh = q_proj[r0:r0 + seq, qc:qc + d_k]          # (S, d_k)
            k_bh = k_proj[r0:r0 + seq, qc:qc + d_k]          # (S, d_k)
            v_bh = v_proj[r0:r0 + seq, vc:vc + d_v]          # (S, d_v)

            # Q @ K^T without materializing a transpose: contract last dims.
            scores = lax.dot_general(
                q_bh.astype(mm), k_bh.astype(mm), (((1,), (1,)), ((), ())),
                preferred_element_type=f32) * scale
            m = jnp.max(scores, axis=-1, keepdims=True)      # f32 softmax
            e = jnp.exp(scores - m)
            denom = jnp.sum(e, axis=-1, keepdims=True)
            # softmax*gamma + visible_M*(1-gamma), normalization folded in.
            blended = e * (gamma / denom) + vm_b
            ctx_bh = jnp.dot(blended.astype(mm), v_bh.astype(mm),
                             preferred_element_type=f32)     # (S, d_v)
            # Stage per-head context at a static lane offset; replaces H
            # separate accumulated ctx @ wo[h] MXU pushes with one big dot.
            ctx_ref[r0:r0 + seq, vc:vc + d_v] = ctx_bh.astype(mm)

    # Single fused output projection across all heads (contraction nhead*d_v).
    out = jnp.dot(ctx_ref[...], wo_ref[...].astype(mm),
                  preferred_element_type=f32) + bo_ref[...]
    if residual:
        out = out + v_in                                     # residual = raw V

    # LayerNorm over the feature axis: single-pass stats (E[x^2] - E[x]^2).
    mean = jnp.mean(out, axis=-1, keepdims=True)
    mean_sq = jnp.mean(out * out, axis=-1, keepdims=True)
    var = mean_sq - mean * mean
    normed = (out - mean) * lax.rsqrt(var + eps)
    normed = normed * lnw_ref[...] + lnb_ref[...]

    # Lane-dense store: pack the b_blk per-batch (S, nhid) slabs along the lane
    # axis so the output's last dim is b_blk*nhid (>=128 here) -> unmasked vst.
    out_ref[...] = jnp.concatenate(
        [normed[b * seq:(b + 1) * seq, :] for b in range(b_blk)], axis=-1)


def multi_head_attention(Q, K, V, visible_M, params, *, nhead, d_k, d_v, gamma,
                         attn_mask=None, residual=True, eps=1e-5,
                         block_b=None, mxu_dtype=jnp.bfloat16):
    """Batched MHA forward. Q/K/V: (B, S, nhid) or (S, nhid); visible_M: (B, S, S) or (S, S)."""
    # attn_mask is accepted for interface parity; the PyTorch forward never applies it.
    del attn_mask
    squeeze = Q.ndim == 2
    if squeeze:
        Q, K, V = Q[None], K[None], V[None]
        visible_M = visible_M[None]
    B, S, nhid = Q.shape
    nq = nhead * d_k
    nv = nhead * d_v

    if block_b is None:
        # Lane-dense output slab (block_b*nhid >= 128 when B allows it).
        block_b = min(B, max(1, pl.cdiv(128, nhid)))
    num_blocks = pl.cdiv(B, block_b)
    Bp = num_blocks * block_b
    if Bp != B:                                   # pad batch to a block multiple
        pad = Bp - B
        zpad = jnp.zeros((pad, S, nhid), Q.dtype)
        Q = jnp.concatenate([Q, zpad], 0)
        K = jnp.concatenate([K, zpad], 0)
        V = jnp.concatenate([V, zpad], 0)
        visible_M = jnp.concatenate(
            [visible_M, jnp.zeros((pad, S, S), visible_M.dtype)], 0)

    rows_blk = block_b * S
    lane_out = block_b * nhid
    Qf = Q.reshape(Bp * S, nhid)
    Kf = K.reshape(Bp * S, nhid)
    Vf = V.reshape(Bp * S, nhid)

    kernel = functools.partial(
        _mha_kernel, b_blk=block_b, seq=S, nhead=nhead, d_k=d_k, d_v=d_v,
        nhid=nhid, gamma=float(gamma), residual=bool(residual),
        eps=float(eps), mxu_dtype=mxu_dtype)

    out = pl.pallas_call(
        kernel,
        out_shape=jax.ShapeDtypeStruct((num_blocks, S, lane_out), jnp.float32),
        grid=(num_blocks,),
        in_specs=[
            pl.BlockSpec((rows_blk, nhid), lambda i: (i, 0)),      # Q rows
            pl.BlockSpec((rows_blk, nhid), lambda i: (i, 0)),      # K rows
            pl.BlockSpec((rows_blk, nhid), lambda i: (i, 0)),      # V rows
            pl.BlockSpec((block_b, S, S), lambda i: (i, 0, 0)),    # visible_M
            pl.BlockSpec((nhid, nq), lambda i: (0, 0)),            # wq
            pl.BlockSpec((nhid, nq), lambda i: (0, 0)),            # wk
            pl.BlockSpec((nhid, nv), lambda i: (0, 0)),            # wv
            pl.BlockSpec((1, nq), lambda i: (0, 0)),               # bq
            pl.BlockSpec((1, nq), lambda i: (0, 0)),               # bk
            pl.BlockSpec((1, nv), lambda i: (0, 0)),               # bv
            pl.BlockSpec((nv, nhid), lambda i: (0, 0)),            # wo
            pl.BlockSpec((1, nhid), lambda i: (0, 0)),             # bo
            pl.BlockSpec((1, nhid), lambda i: (0, 0)),             # ln_w
            pl.BlockSpec((1, nhid), lambda i: (0, 0)),             # ln_b
        ],
        out_specs=pl.BlockSpec((None, S, lane_out), lambda i: (i, 0, 0)),
        scratch_shapes=[pltpu.VMEM((rows_blk, nv), mxu_dtype)],    # ctx staging
        compiler_params=pltpu.CompilerParams(
            dimension_semantics=("parallel",)),
    )(Qf, Kf, Vf, visible_M,
      params["wq"], params["wk"], params["wv"],
      params["bq"], params["bk"], params["bv"],
      params["wo"], params["bo"], params["ln_w"], params["ln_b"])

    # Un-pack the lane-dense slab: (blocks, S, block_b*nhid) -> (B, S, nhid).
    out = out.reshape(num_blocks, S, block_b, nhid).transpose(0, 2, 1, 3)
    out = out.reshape(Bp, S, nhid)[:B]
    return out[0] if squeeze else out


def _reference(Q, K, V, visible_M, params, *, nhead, d_k, d_v, gamma,
               residual=True, eps=1e-5):
    """Plain-JAX f32 reference mirroring the PyTorch forward (batched)."""
    B, S, nhid = Q.shape
    q = (Q @ params["wq"] + params["bq"]).reshape(B, S, nhead, d_k).transpose(0, 2, 1, 3)
    k = (K @ params["wk"] + params["bk"]).reshape(B, S, nhead, d_k).transpose(0, 2, 1, 3)
    v = (V @ params["wv"] + params["bv"]).reshape(B, S, nhead, d_v).transpose(0, 2, 1, 3)
    scores = jnp.einsum("bhqd,bhkd->bhqk", q, k) / np.sqrt(d_k)
    attn = jax.nn.softmax(scores, axis=-1)
    vm = jnp.broadcast_to(visible_M[:, None], attn.shape)
    ctx = jnp.einsum("bhqk,bhkd->bhqd", attn * gamma + vm * (1 - gamma), v)
    ctx = ctx.transpose(0, 2, 1, 3).reshape(B, S, nhead * d_v)
    out = ctx @ params["wo"] + params["bo"]
    if residual:
        out = out + V
    mean = out.mean(-1, keepdims=True)
    var = ((out - mean) ** 2).mean(-1, keepdims=True)
    return (out - mean) / jnp.sqrt(var + eps) * params["ln_w"] + params["ln_b"]


if __name__ == "__main__":
    # Hyperparameters implied by the module's __init__ (args.*). batch=8 gives a
    # grid of 2 blocks (4 sequences each) -> 128-lane output slab, even grid.
    batch = 8
    seq = 8
    nhid = 32
    nhead = 4
    d_k = 8
    d_v = 8
    gamma = 0.7
    residual = True

    key = jax.random.PRNGKey(0)
    keys = jax.random.split(key, 12)

    def _linear(kw, kb, fan_in, fan_out):
        bound = 1.0 / np.sqrt(fan_in)
        w = jax.random.uniform(kw, (fan_in, fan_out), jnp.float32, -bound, bound)
        b = jax.random.uniform(kb, (1, fan_out), jnp.float32, -bound, bound)
        return w, b

    wq, bq = _linear(keys[0], keys[1], nhid, d_k * nhead)
    wk, bk = _linear(keys[2], keys[3], nhid, d_k * nhead)
    wv, bv = _linear(keys[4], keys[5], nhid, d_v * nhead)
    wo, bo = _linear(keys[6], keys[7], nhead * d_v, nhid)
    params = dict(
        wq=wq, bq=bq, wk=wk, bk=bk, wv=wv, bv=bv, wo=wo, bo=bo,
        ln_w=jnp.ones((1, nhid), jnp.float32),
        ln_b=jnp.zeros((1, nhid), jnp.float32),
    )

    Q = jax.random.normal(keys[8], (batch, seq, nhid), jnp.float32)
    K = jax.random.normal(keys[9], (batch, seq, nhid), jnp.float32)
    V = jax.random.normal(keys[10], (batch, seq, nhid), jnp.float32)
    # visible_M: row-stochastic-ish matrix blended into the attention weights.
    visible_M = jax.nn.softmax(
        jax.random.normal(keys[11], (batch, seq, seq), jnp.float32), axis=-1)

    ref = _reference(
        Q, K, V, visible_M, params,
        nhead=nhead, d_k=d_k, d_v=d_v, gamma=gamma, residual=residual)

    # Exact-f32 mode: tight check against the f32 reference.
    out_f32 = multi_head_attention(
        Q, K, V, visible_M, params,
        nhead=nhead, d_k=d_k, d_v=d_v, gamma=gamma, residual=residual,
        mxu_dtype=jnp.float32)
    out_f32 = jax.block_until_ready(out_f32)
    np.testing.assert_allclose(np.asarray(out_f32), np.asarray(ref),
                               rtol=5e-4, atol=5e-4)

    # Default performance mode: bf16 MXU operands, f32 softmax/LayerNorm.
    out_bf16 = multi_head_attention(
        Q, K, V, visible_M, params,
        nhead=nhead, d_k=d_k, d_v=d_v, gamma=gamma, residual=residual,
        mxu_dtype=jnp.bfloat16)
    out_bf16 = jax.block_until_ready(out_bf16)
    np.testing.assert_allclose(np.asarray(out_bf16), np.asarray(ref),
                               rtol=4e-2, atol=4e-2)

    print("KERNEL_OK")
</pallas_src>

<mosaic_0001>
module attributes {stable_mosaic.version = 11 : i64} {
  func.func @_mha_kernel(%arg0: i32, %arg1: memref<32x32xf32, #tpu.memory_space<vmem>>, %arg2: memref<32x32xf32, #tpu.memory_space<vmem>>, %arg3: memref<32x32xf32, #tpu.memory_space<vmem>>, %arg4: memref<4x8x8xf32, #tpu.memory_space<vmem>>, %arg5: memref<32x32xf32, #tpu.memory_space<vmem>>, %arg6: memref<32x32xf32, #tpu.memory_space<vmem>>, %arg7: memref<32x32xf32, #tpu.memory_space<vmem>>, %arg8: memref<1x32xf32, #tpu.memory_space<vmem>>, %arg9: memref<1x32xf32, #tpu.memory_space<vmem>>, %arg10: memref<1x32xf32, #tpu.memory_space<vmem>>, %arg11: memref<32x32xf32, #tpu.memory_space<vmem>>, %arg12: memref<1x32xf32, #tpu.memory_space<vmem>>, %arg13: memref<1x32xf32, #tpu.memory_space<vmem>>, %arg14: memref<1x32xf32, #tpu.memory_space<vmem>>, %arg15: memref<1x8x128xf32, #tpu.memory_space<vmem>>, %arg16: memref<32x32xf32, #tpu.memory_space<vmem>>) attributes {dimension_semantics = [#tpu.dimension_semantics<parallel>], iteration_bounds = array<i64: 2>, scalar_prefetch = 0 : i64, scratch_operands = 1 : i64, tpu.core_type = #tpu.core_type<tc>, window_params = [{transform_indices = @transform_0, window_bounds = array<i64: 32, 32>}, {transform_indices = @transform_1, window_bounds = array<i64: 32, 32>}, {transform_indices = @transform_2, window_bounds = array<i64: 32, 32>}, {transform_indices = @transform_3, window_bounds = array<i64: 4, 8, 8>}, {pipeline_mode = #tpu.pipeline_mode<synchronous>, transform_indices = @transform_4, window_bounds = array<i64: 32, 32>}, {pipeline_mode = #tpu.pipeline_mode<synchronous>, transform_indices = @transform_5, window_bounds = array<i64: 32, 32>}, {pipeline_mode = #tpu.pipeline_mode<synchronous>, transform_indices = @transform_6, window_bounds = array<i64: 32, 32>}, {pipeline_mode = #tpu.pipeline_mode<synchronous>, transform_indices = @transform_7, window_bounds = array<i64: 1, 32>}, {pipeline_mode = #tpu.pipeline_mode<synchronous>, transform_indices = @transform_8, window_bounds = array<i64: 1, 32>}, {pipeline_mode = #tpu.pipeline_mode<synchronous>, transform_indices = @transform_9, window_bounds = array<i64: 1, 32>}, {pipeline_mode = #tpu.pipeline_mode<synchronous>, transform_indices = @transform_10, window_bounds = array<i64: 32, 32>}, {pipeline_mode = #tpu.pipeline_mode<synchronous>, transform_indices = @transform_11, window_bounds = array<i64: 1, 32>}, {pipeline_mode = #tpu.pipeline_mode<synchronous>, transform_indices = @transform_12, window_bounds = array<i64: 1, 32>}, {pipeline_mode = #tpu.pipeline_mode<synchronous>, transform_indices = @transform_13, window_bounds = array<i64: 1, 32>}, {transform_indices = @transform_14, window_bounds = array<i64: 1, 8, 128>}]} {
    %c0 = arith.constant 0 : index
    %c0_0 = arith.constant 0 : index
    %0 = vector.load %arg1[%c0, %c0_0] : memref<32x32xf32, #tpu.memory_space<vmem>>, vector<32x32xf32>
    %c0_1 = arith.constant 0 : index
    %c0_2 = arith.constant 0 : index
    %1 = vector.load %arg2[%c0_1, %c0_2] : memref<32x32xf32, #tpu.memory_space<vmem>>, vector<32x32xf32>
    %c0_3 = arith.constant 0 : index
    %c0_4 = arith.constant 0 : index
    %2 = vector.load %arg3[%c0_3, %c0_4] : memref<32x32xf32, #tpu.memory_space<vmem>>, vector<32x32xf32>
    %c0_5 = arith.constant 0 : index
    %c0_6 = arith.constant 0 : index
    %3 = vector.load %arg5[%c0_5, %c0_6] : memref<32x32xf32, #tpu.memory_space<vmem>>, vector<32x32xf32>
    %cst = arith.constant dense<0.000000e+00> : vector<32x32xf32>
    %4 = tpu.matmul %0, %3, %cst {dimension_numbers = #tpu.dot_dimension_numbers<[1], [0], [0], [1], [0, 0, 1, 1], [], []>} : vector<32x32xf32>, vector<32x32xf32>, vector<32x32xf32> -> vector<32x32xf32>
    %c0_7 = arith.constant 0 : index
    %c0_8 = arith.constant 0 : index
    %5 = vector.load %arg8[%c0_7, %c0_8] : memref<1x32xf32, #tpu.memory_space<vmem>>, vector<1x32xf32>
    %6 = vector.broadcast %5 : vector<1x32xf32> to vector<32x32xf32>
    %7 = arith.addf %4, %6 : vector<32x32xf32>
    %c0_9 = arith.constant 0 : index
    %c0_10 = arith.constant 0 : index
    %8 = vector.load %arg6[%c0_9, %c0_10] : memref<32x32xf32, #tpu.memory_space<vmem>>, vector<32x32xf32>
    %cst_11 = arith.constant dense<0.000000e+00> : vector<32x32xf32>
    %9 = tpu.matmul %1, %8, %cst_11 {dimension_numbers = #tpu.dot_dimension_numbers<[1], [0], [0], [1], [0, 0, 1, 1], [], []>} : vector<32x32xf32>, vector<32x32xf32>, vector<32x32xf32> -> vector<32x32xf32>
    %c0_12 = arith.constant 0 : index
    %c0_13 = arith.constant 0 : index
    %10 = vector.load %arg9[%c0_12, %c0_13] : memref<1x32xf32, #tpu.memory_space<vmem>>, vector<1x32xf32>
    %11 = vector.broadcast %10 : vector<1x32xf32> to vector<32x32xf32>
    %12 = arith.addf %9, %11 : vector<32x32xf32>
    %c0_14 = arith.constant 0 : index
    %c0_15 = arith.constant 0 : index
    %13 = vector.load %arg7[%c0_14, %c0_15] : memref<32x32xf32, #tpu.memory_space<vmem>>, vector<32x32xf32>
    %cst_16 = arith.constant dense<0.000000e+00> : vector<32x32xf32>
    %14 = tpu.matmul %2, %13, %cst_16 {dimension_numbers = #tpu.dot_dimension_numbers<[1], [0], [0], [1], [0, 0, 1, 1], [], []>} : vector<32x32xf32>, vector<32x32xf32>, vector<32x32xf32> -> vector<32x32xf32>
    %c0_17 = arith.constant 0 : index
    %c0_18 = arith.constant 0 : index
    %15 = vector.load %arg10[%c0_17, %c0_18] : memref<1x32xf32, #tpu.memory_space<vmem>>, vector<1x32xf32>
    %16 = vector.broadcast %15 : vector<1x32xf32> to vector<32x32xf32>
    %17 = arith.addf %14, %16 : vector<32x32xf32>
    %c0_19 = arith.constant 0 : index
    %c0_20 = arith.constant 0 : index
    %c0_21 = arith.constant 0 : index
    %18 = vector.load %arg4[%c0_19, %c0_20, %c0_21] : memref<4x8x8xf32, #tpu.memory_space<vmem>>, vector<1x8x8xf32>
    %19 = vector.shape_cast %18 : vector<1x8x8xf32> to vector<8x8xf32>
    %cst_22 = arith.constant 3.000000e-01 : f32
    %20 = vector.broadcast %cst_22 : f32 to vector<8x8xf32>
    %21 = arith.mulf %19, %20 : vector<8x8xf32>
    %22 = vector.extract_strided_slice %7 {offsets = [0, 0], sizes = [8, 8], strides = [1, 1]} : vector<32x32xf32> to vector<8x8xf32>
    %23 = vector.extract_strided_slice %12 {offsets = [0, 0], sizes = [8, 8], strides = [1, 1]} : vector<32x32xf32> to vector<8x8xf32>
    %24 = vector.extract_strided_slice %17 {offsets = [0, 0], sizes = [8, 8], strides = [1, 1]} : vector<32x32xf32> to vector<8x8xf32>
    %cst_23 = arith.constant dense<0.000000e+00> : vector<8x8xf32>
    %25 = tpu.matmul %22, %23, %cst_23 {dimension_numbers = #tpu.dot_dimension_numbers<[1], [1], [0], [0], [0, 0, 1, 0], [], []>} : vector<8x8xf32>, vector<8x8xf32>, vector<8x8xf32> -> vector<8x8xf32>
    %cst_24 = arith.constant 0.353553385 : f32
    %26 = vector.broadcast %cst_24 : f32 to vector<8x8xf32>
    %27 = arith.mulf %25, %26 : vector<8x8xf32>
    %cst_25 = arith.constant dense<0xFF800000> : vector<8xf32>
    %28 = vector.multi_reduction <maximumf>, %27, %cst_25 [1] : vector<8x8xf32> to vector<8xf32>
    %29 = vector.shape_cast %28 : vector<8xf32> to vector<8x1xf32>
    %30 = vector.broadcast %29 : vector<8x1xf32> to vector<8x8xf32>
    %31 = arith.subf %27, %30 : vector<8x8xf32>
    %32 = math.exp %31 : vector<8x8xf32>
    %cst_26 = arith.constant dense<0.000000e+00> : vector<8xf32>
    %33 = vector.multi_reduction <add>, %32, %cst_26 [1] : vector<8x8xf32> to vector<8xf32>
    %34 = vector.shape_cast %33 : vector<8xf32> to vector<8x1xf32>
    %cst_27 = arith.constant 0.699999988 : f32
    %35 = vector.broadcast %cst_27 : f32 to vector<8x1xf32>
    %36 = arith.divf %35, %34 : vector<8x1xf32>
    %37 = vector.broadcast %36 : vector<8x1xf32> to vector<8x8xf32>
    %38 = arith.mulf %32, %37 : vector<8x8xf32>
    %39 = arith.addf %38, %21 : vector<8x8xf32>
    %cst_28 = arith.constant dense<0.000000e+00> : vector<8x8xf32>
    %40 = tpu.matmul %39, %24, %cst_28 {dimension_numbers = #tpu.dot_dimension_numbers<[1], [0], [0], [1], [0, 0, 1, 1], [], []>} : vector<8x8xf32>, vector<8x8xf32>, vector<8x8xf32> -> vector<8x8xf32>
    %c0_29 = arith.constant 0 : index
    %c0_30 = arith.constant 0 : index
    %41 = vector.load %arg16[%c0_29, %c0_30] : memref<32x32xf32, #tpu.memory_space<vmem>>, vector<8x8xf32>
    tpu.vector_store %arg16[%c0_29, %c0_30], %40 {strides = array<i32>} : memref<32x32xf32, #tpu.memory_space<vmem>>, vector<8x8xf32>,
    %42 = vector.extract_strided_slice %7 {offsets = [0, 8], sizes = [8, 8], strides = [1, 1]} : vector<32x32xf32> to vector<8x8xf32>
    %43 = vector.extract_strided_slice %12 {offsets = [0, 8], sizes = [8, 8], strides = [1, 1]} : vector<32x32xf32> to vector<8x8xf32>
    %44 = vector.extract_strided_slice %17 {offsets = [0, 8], sizes = [8, 8], strides = [1, 1]} : vector<32x32xf32> to vector<8x8xf32>
    %cst_31 = arith.constant dense<0.000000e+00> : vector<8x8xf32>
    %45 = tpu.matmul %42, %43, %cst_31 {dimension_numbers = #tpu.dot_dimension_numbers<[1], [1], [0], [0], [0, 0, 1, 0], [], []>} : vector<8x8xf32>, vector<8x8xf32>, vector<8x8xf32> -> vector<8x8xf32>
    %cst_32 = arith.constant 0.353553385 : f32
    %46 = vector.broadcast %cst_32 : f32 to vector<8x8xf32>
    %47 = arith.mulf %45, %46 : vector<8x8xf32>
    %cst_33 = arith.constant dense<0xFF800000> : vector<8xf32>
    %48 = vector.multi_reduction <maximumf>, %47, %cst_33 [1] : vector<8x8xf32> to vector<8xf32>
    %49 = vector.shape_cast %48 : vector<8xf32> to vector<8x1xf32>
    %50 = vector.broadcast %49 : vector<8x1xf32> to vector<8x8xf32>
    %51 = arith.subf %47, %50 : vector<8x8xf32>
    %52 = math.exp %51 : vector<8x8xf32>
    %cst_34 = arith.constant dense<0.000000e+00> : vector<8xf32>
    %53 = vector.multi_reduction <add>, %52, %cst_34 [1] : vector<8x8xf32> to vector<8xf32>
    %54 = vector.shape_cast %53 : vector<8xf32> to vector<8x1xf32>
    %cst_35 = arith.constant 0.699999988 : f32
    %55 = vector.broadcast %cst_35 : f32 to vector<8x1xf32>
    %56 = arith.divf %55, %54 : vector<8x1xf32>
    %57 = vector.broadcast %56 : vector<8x1xf32> to vector<8x8xf32>
    %58 = arith.mulf %52, %57 : vector<8x8xf32>
    %59 = arith.addf %58, %21 : vector<8x8xf32>
    %cst_36 = arith.constant dense<0.000000e+00> : vector<8x8xf32>
    %60 = tpu.matmul %59, %44, %cst_36 {dimension_numbers = #tpu.dot_dimension_numbers<[1], [0], [0], [1], [0, 0, 1, 1], [], []>} : vector<8x8xf32>, vector<8x8xf32>, vector<8x8xf32> -> vector<8x8xf32>
    %c0_37 = arith.constant 0 : index
    %c8 = arith.constant 8 : index
    %61 = vector.load %arg16[%c0_37, %c8] : memref<32x32xf32, #tpu.memory_space<vmem>>, vector<8x8xf32>
    tpu.vector_store %arg16[%c0_37, %c8], %60 {strides = array<i32>} : memref<32x32xf32, #tpu.memory_space<vmem>>, vector<8x8xf32>,
    %62 = vector.extract_strided_slice %7 {offsets = [0, 16], sizes = [8, 8], strides = [1, 1]} : vector<32x32xf32> to vector<8x8xf32>
    %63 = vector.extract_strided_slice %12 {offsets = [0, 16], sizes = [8, 8], strides = [1, 1]} : vector<32x32xf32> to vector<8x8xf32>
    %64 = vector.extract_strided_slice %17 {offsets = [0, 16], sizes = [8, 8], strides = [1, 1]} : vector<32x32xf32> to vector<8x8xf32>
    %cst_38 = arith.constant dense<0.000000e+00> : vector<8x8xf32>
    %65 = tpu.matmul %62, %63, %cst_38 {dimension_numbers = #tpu.dot_dimension_numbers<[1], [1], [0], [0], [0, 0, 1, 0], [], []>} : vector<8x8xf32>, vector<8x8xf32>, vector<8x8xf32> -> vector<8x8xf32>
    %cst_39 = arith.constant 0.353553385 : f32
    %66 = vector.broadcast %cst_39 : f32 to vector<8x8xf32>
    %67 = arith.mulf %65, %66 : vector<8x8xf32>
    %cst_40 = arith.constant dense<0xFF800000> : vector<8xf32>
    %68 = vector.multi_reduction <maximumf>, %67, %cst_40 [1] : vector<8x8xf32> to vector<8xf32>
    %69 = vector.shape_cast %68 : vector<8xf32> to vector<8x1xf32>
    %70 = vector.broadcast %69 : vector<8x1xf32> to vector<8x8xf32>
    %71 = arith.subf %67, %70 : vector<8x8xf32>
    %72 = math.exp %71 : vector<8x8xf32>
    %cst_41 = arith.constant dense<0.000000e+00> : vector<8xf32>
    %73 = vector.multi_reduction <add>, %72, %cst_41 [1] : vector<8x8xf32> to vector<8xf32>
    %74 = vector.shape_cast %73 : vector<8xf32> to vector<8x1xf32>
    %cst_42 = arith.constant 0.699999988 : f32
    %75 = vector.broadcast %cst_42 : f32 to vector<8x1xf32>
    %76 = arith.divf %75, %74 : vector<8x1xf32>
    %77 = vector.broadcast %76 : vector<8x1xf32> to vector<8x8xf32>
    %78 = arith.mulf %72, %77 : vector<8x8xf32>
    %79 = arith.addf %78, %21 : vector<8x8xf32>
    %cst_43 = arith.constant dense<0.000000e+00> : vector<8x8xf32>
    %80 = tpu.matmul %79, %64, %cst_43 {dimension_numbers = #tpu.dot_dimension_numbers<[1], [0], [0], [1], [0, 0, 1, 1], [], []>} : vector<8x8xf32>, vector<8x8xf32>, vector<8x8xf32> -> vector<8x8xf32>
    %c0_44 = arith.constant 0 : index
    %c16 = arith.constant 16 : index
    %81 = vector.load %arg16[%c0_44, %c16] : memref<32x32xf32, #tpu.memory_space<vmem>>, vector<8x8xf32>
    tpu.vector_store %arg16[%c0_44, %c16], %80 {strides = array<i32>} : memref<32x32xf32, #tpu.memory_space<vmem>>, vector<8x8xf32>,
    %82 = vector.extract_strided_slice %7 {offsets = [0, 24], sizes = [8, 8], strides = [1, 1]} : vector<32x32xf32> to vector<8x8xf32>
    %83 = vector.extract_strided_slice %12 {offsets = [0, 24], sizes = [8, 8], strides = [1, 1]} : vector<32x32xf32> to vector<8x8xf32>
    %84 = vector.extract_strided_slice %17 {offsets = [0, 24], sizes = [8, 8], strides = [1, 1]} : vector<32x32xf32> to vector<8x8xf32>
    %cst_45 = arith.constant dense<0.000000e+00> : vector<8x8xf32>
    %85 = tpu.matmul %82, %83, %cst_45 {dimension_numbers = #tpu.dot_dimension_numbers<[1], [1], [0], [0], [0, 0, 1, 0], [], []>} : vector<8x8xf32>, vector<8x8xf32>, vector<8x8xf32> -> vector<8x8xf32>
    %cst_46 = arith.constant 0.353553385 : f32
    %86 = vector.broadcast %cst_46 : f32 to vector<8x8xf32>
    %87 = arith.mulf %85, %86 : vector<8x8xf32>
    %cst_47 = arith.constant dense<0xFF800000> : vector<8xf32>
    %88 = vector.multi_reduction <maximumf>, %87, %cst_47 [1] : vector<8x8xf32> to vector<8xf32>
    %89 = vector.shape_cast %88 : vector<8xf32> to vector<8x1xf32>
    %90 = vector.broadcast %89 : vector<8x1xf32> to vector<8x8xf32>
    %91 = arith.subf %87, %90 : vector<8x8xf32>
    %92 = math.exp %91 : vector<8x8xf32>
    %cst_48 = arith.constant dense<0.000000e+00> : vector<8xf32>
    %93 = vector.multi_reduction <add>, %92, %cst_48 [1] : vector<8x8xf32> to vector<8xf32>
    %94 = vector.shape_cast %93 : vector<8xf32> to vector<8x1xf32>
    %cst_49 = arith.constant 0.699999988 : f32
    %95 = vector.broadcast %cst_49 : f32 to vector<8x1xf32>
    %96 = arith.divf %95, %94 : vector<8x1xf32>
    %97 = vector.broadcast %96 : vector<8x1xf32> to vector<8x8xf32>
    %98 = arith.mulf %92, %97 : vector<8x8xf32>
    %99 = arith.addf %98, %21 : vector<8x8xf32>
    %cst_50 = arith.constant dense<0.000000e+00> : vector<8x8xf32>
    %100 = tpu.matmul %99, %84, %cst_50 {dimension_numbers = #tpu.dot_dimension_numbers<[1], [0], [0], [1], [0, 0, 1, 1], [], []>} : vector<8x8xf32>, vector<8x8xf32>, vector<8x8xf32> -> vector<8x8xf32>
    %c0_51 = arith.constant 0 : index
    %c24 = arith.constant 24 : index
    %101 = vector.load %arg16[%c0_51, %c24] : memref<32x32xf32, #tpu.memory_space<vmem>>, vector<8x8xf32>
    tpu.vector_store %arg16[%c0_51, %c24], %100 {strides = array<i32>} : memref<32x32xf32, #tpu.memory_space<vmem>>, vector<8x8xf32>,
    %c1 = arith.constant 1 : index
    %c0_52 = arith.constant 0 : index
    %c0_53 = arith.constant 0 : index
    %102 = vector.load %arg4[%c1, %c0_52, %c0_53] : memref<4x8x8xf32, #tpu.memory_space<vmem>>, vector<1x8x8xf32>
    %103 = vector.shape_cast %102 : vector<1x8x8xf32> to vector<8x8xf32>
    %cst_54 = arith.constant 3.000000e-01 : f32
    %104 = vector.broadcast %cst_54 : f32 to vector<8x8xf32>
    %105 = arith.mulf %103, %104 : vector<8x8xf32>
    %106 = vector.extract_strided_slice %7 {offsets = [8, 0], sizes = [8, 8], strides = [1, 1]} : vector<32x32xf32> to vector<8x8xf32>
    %107 = vector.extract_strided_slice %12 {offsets = [8, 0], sizes = [8, 8], strides = [1, 1]} : vector<32x32xf32> to vector<8x8xf32>
    %108 = vector.extract_strided_slice %17 {offsets = [8, 0], sizes = [8, 8], strides = [1, 1]} : vector<32x32xf32> to vector<8x8xf32>
    %cst_55 = arith.constant dense<0.000000e+00> : vector<8x8xf32>
    %109 = tpu.matmul %106, %107, %cst_55 {dimension_numbers = #tpu.dot_dimension_numbers<[1], [1], [0], [0], [0, 0, 1, 0], [], []>} : vector<8x8xf32>, vector<8x8xf32>, vector<8x8xf32> -> vector<8x8xf32>
    %cst_56 = arith.constant 0.353553385 : f32
    %110 = vector.broadcast %cst_56 : f32 to vector<8x8xf32>
    %111 = arith.mulf %109, %110 : vector<8x8xf32>
    %cst_57 = arith.constant dense<0xFF800000> : vector<8xf32>
    %112 = vector.multi_reduction <maximumf>, %111, %cst_57 [1] : vector<8x8xf32> to vector<8xf32>
    %113 = vector.shape_cast %112 : vector<8xf32> to vector<8x1xf32>
    %114 = vector.broadcast %113 : vector<8x1xf32> to vector<8x8xf32>
    %115 = arith.subf %111, %114 : vector<8x8xf32>
    %116 = math.exp %115 : vector<8x8xf32>
    %cst_58 = arith.constant dense<0.000000e+00> : vector<8xf32>
    %117 = vector.multi_reduction <add>, %116, %cst_58 [1] : vector<8x8xf32> to vector<8xf32>
    %118 = vector.shape_cast %117 : vector<8xf32> to vector<8x1xf32>
    %cst_59 = arith.constant 0.699999988 : f32
    %119 = vector.broadcast %cst_59 : f32 to vector<8x1xf32>
    %120 = arith.divf %119, %118 : vector<8x1xf32>
    %121 = vector.broadcast %120 : vector<8x1xf32> to vector<8x8xf32>
    %122 = arith.mulf %116, %121 : vector<8x8xf32>
    %123 = arith.addf %122, %105 : vector<8x8xf32>
    %cst_60 = arith.constant dense<0.000000e+00> : vector<8x8xf32>
    %124 = tpu.matmul %123, %108, %cst_60 {dimension_numbers = #tpu.dot_dimension_numbers<[1], [0], [0], [1], [0, 0, 1, 1], [], []>} : vector<8x8xf32>, vector<8x8xf32>, vector<8x8xf32> -> vector<8x8xf32>
    %c8_61 = arith.constant 8 : index
    %c0_62 = arith.constant 0 : index
    %125 = vector.load %arg16[%c8_61, %c0_62] : memref<32x32xf32, #tpu.memory_space<vmem>>, vector<8x8xf32>
    tpu.vector_store %arg16[%c8_61, %c0_62], %124 {strides = array<i32>} : memref<32x32xf32, #tpu.memory_space<vmem>>, vector<8x8xf32>,
    %126 = vector.extract_strided_slice %7 {offsets = [8, 8], sizes = [8, 8], strides = [1, 1]} : vector<32x32xf32> to vector<8x8xf32>
    %127 = vector.extract_strided_slice %12 {offsets = [8, 8], sizes = [8, 8], strides = [1, 1]} : vector<32x32xf32> to vector<8x8xf32>
    %128 = vector.extract_strided_slice %17 {offsets = [8, 8], sizes = [8, 8], strides = [1, 1]} : vector<32x32xf32> to vector<8x8xf32>
    %cst_63 = arith.constant dense<0.000000e+00> : vector<8x8xf32>
    %129 = tpu.matmul %126, %127, %cst_63 {dimension_numbers = #tpu.dot_dimension_numbers<[1], [1], [0], [0], [0, 0, 1, 0], [], []>} : vector<8x8xf32>, vector<8x8xf32>, vector<8x8xf32> -> vector<8x8xf32>
    %cst_64 = arith.constant 0.353553385 : f32
    %130 = vector.broadcast %cst_64 : f32 to vector<8x8xf32>
    %131 = arith.mulf %129, %130 : vector<8x8xf32>
    %cst_65 = arith.constant dense<0xFF800000> : vector<8xf32>
    %132 = vector.multi_reduction <maximumf>, %131, %cst_65 [1] : vector<8x8xf32> to vector<8xf32>
    %133 = vector.shape_cast %132 : vector<8xf32> to vector<8x1xf32>
    %134 = vector.broadcast %133 : vector<8x1xf32> to vector<8x8xf32>
    %135 = arith.subf %131, %134 : vector<8x8xf32>
    %136 = math.exp %135 : vector<8x8xf32>
    %cst_66 = arith.constant dense<0.000000e+00> : vector<8xf32>
    %137 = vector.multi_reduction <add>, %136, %cst_66 [1] : vector<8x8xf32> to vector<8xf32>
    %138 = vector.shape_cast %137 : vector<8xf32> to vector<8x1xf32>
    %cst_67 = arith.constant 0.699999988 : f32
    %139 = vector.broadcast %cst_67 : f32 to vector<8x1xf32>
    %140 = arith.divf %139, %138 : vector<8x1xf32>
    %141 = vector.broadcast %140 : vector<8x1xf32> to vector<8x8xf32>
    %142 = arith.mulf %136, %141 : vector<8x8xf32>
    %143 = arith.addf %142, %105 : vector<8x8xf32>
    %cst_68 = arith.constant dense<0.000000e+00> : vector<8x8xf32>
    %144 = tpu.matmul %143, %128, %cst_68 {dimension_numbers = #tpu.dot_dimension_numbers<[1], [0], [0], [1], [0, 0, 1, 1], [], []>} : vector<8x8xf32>, vector<8x8xf32>, vector<8x8xf32> -> vector<8x8xf32>
    %c8_69 = arith.constant 8 : index
    %c8_70 = arith.constant 8 : index
    %145 = vector.load %arg16[%c8_69, %c8_70] : memref<32x32xf32, #tpu.memory_space<vmem>>, vector<8x8xf32>
    tpu.vector_store %arg16[%c8_69, %c8_70], %144 {strides = array<i32>} : memref<32x32xf32, #tpu.memory_space<vmem>>, vector<8x8xf32>,
    %146 = vector.extract_strided_slice %7 {offsets = [8, 16], sizes = [8, 8], strides = [1, 1]} : vector<32x32xf32> to vector<8x8xf32>
    %147 = vector.extract_strided_slice %12 {offsets = [8, 16], sizes = [8, 8], strides = [1, 1]} : vector<32x32xf32> to vector<8x8xf32>
    %148 = vector.extract_strided_slice %17 {offsets = [8, 16], sizes = [8, 8], strides = [1, 1]} : vector<32x32xf32> to vector<8x8xf32>
    %cst_71 = arith.constant dense<0.000000e+00> : vector<8x8xf32>
    %149 = tpu.matmul %146, %147, %cst_71 {dimension_numbers = #tpu.dot_dimension_numbers<[1], [1], [0], [0], [0, 0, 1, 0], [], []>} : vector<8x8xf32>, vector<8x8xf32>, vector<8x8xf32> -> vector<8x8xf32>
    %cst_72 = arith.constant 0.353553385 : f32
    %150 = vector.broadcast %cst_72 : f32 to vector<8x8xf32>
    %151 = arith.mulf %149, %150 : vector<8x8xf32>
    %cst_73 = arith.constant dense<0xFF800000> : vector<8xf32>
    %152 = vector.multi_reduction <maximumf>, %151, %cst_73 [1] : vector<8x8xf32> to vector<8xf32>
    %153 = vector.shape_cast %152 : vector<8xf32> to vector<8x1xf32>
    %154 = vector.broadcast %153 : vector<8x1xf32> to vector<8x8xf32>
    %155 = arith.subf %151, %154 : vector<8x8xf32>
    %156 = math.exp %155 : vector<8x8xf32>
    %cst_74 = arith.constant dense<0.000000e+00> : vector<8xf32>
    %157 = vector.multi_reduction <add>, %156, %cst_74 [1] : vector<8x8xf32> to vector<8xf32>
    %158 = vector.shape_cast %157 : vector<8xf32> to vector<8x1xf32>
    %cst_75 = arith.constant 0.699999988 : f32
    %159 = vector.broadcast %cst_75 : f32 to vector<8x1xf32>
    %160 = arith.divf %159, %158 : vector<8x1xf32>
    %161 = vector.broadcast %160 : vector<8x1xf32> to vector<8x8xf32>
    %162 = arith.mulf %156, %161 : vector<8x8xf32>
    %163 = arith.addf %162, %105 : vector<8x8xf32>
    %cst_76 = arith.constant dense<0.000000e+00> : vector<8x8xf32>
    %164 = tpu.matmul %163, %148, %cst_76 {dimension_numbers = #tpu.dot_dimension_numbers<[1], [0], [0], [1], [0, 0, 1, 1], [], []>} : vector<8x8xf32>, vector<8x8xf32>, vector<8x8xf32> -> vector<8x8xf32>
    %c8_77 = arith.constant 8 : index
    %c16_78 = arith.constant 16 : index
    %165 = vector.load %arg16[%c8_77, %c16_78] : memref<32x32xf32, #tpu.memory_space<vmem>>, vector<8x8xf32>
    tpu.vector_store %arg16[%c8_77, %c16_78], %164 {strides = array<i32>} : memref<32x32xf32, #tpu.memory_space<vmem>>, vector<8x8xf32>,
    %166 = vector.extract_strided_slice %7 {offsets = [8, 24], sizes = [8, 8], strides = [1, 1]} : vector<32x32xf32> to vector<8x8xf32>
    %167 = vector.extract_strided_slice %12 {offsets = [8, 24], sizes = [8, 8], strides = [1, 1]} : vector<32x32xf32> to vector<8x8xf32>
    %168 = vector.extract_strided_slice %17 {offsets = [8, 24], sizes = [8, 8], strides = [1, 1]} : vector<32x32xf32> to vector<8x8xf32>
    %cst_79 = arith.constant dense<0.000000e+00> : vector<8x8xf32>
    %169 = tpu.matmul %166, %167, %cst_79 {dimension_numbers = #tpu.dot_dimension_numbers<[1], [1], [0], [0], [0, 0, 1, 0], [], []>} : vector<8x8xf32>, vector<8x8xf32>, vector<8x8xf32> -> vector<8x8xf32>
    %cst_80 = arith.constant 0.353553385 : f32
    %170 = vector.broadcast %cst_80 : f32 to vector<8x8xf32>
    %171 = arith.mulf %169, %170 : vector<8x8xf32>
    %cst_81 = arith.constant dense<0xFF800000> : vector<8xf32>
    %172 = vector.multi_reduction <maximumf>, %171, %cst_81 [1] : vector<8x8xf32> to vector<8xf32>
    %173 = vector.shape_cast %172 : vector<8xf32> to vector<8x1xf32>
    %174 = vector.broadcast %173 : vector<8x1xf32> to vector<8x8xf32>
    %175 = arith.subf %171, %174 : vector<8x8xf32>
    %176 = math.exp %175 : vector<8x8xf32>
    %cst_82 = arith.constant dense<0.000000e+00> : vector<8xf32>
    %177 = vector.multi_reduction <add>, %176, %cst_82 [1] : vector<8x8xf32> to vector<8xf32>
    %178 = vector.shape_cast %177 : vector<8xf32> to vector<8x1xf32>
    %cst_83 = arith.constant 0.699999988 : f32
    %179 = vector.broadcast %cst_83 : f32 to vector<8x1xf32>
    %180 = arith.divf %179, %178 : vector<8x1xf32>
    %181 = vector.broadcast %180 : vector<8x1xf32> to vector<8x8xf32>
    %182 = arith.mulf %176, %181 : vector<8x8xf32>
    %183 = arith.addf %182, %105 : vector<8x8xf32>
    %cst_84 = arith.constant dense<0.000000e+00> : vector<8x8xf32>
    %184 = tpu.matmul %183, %168, %cst_84 {dimension_numbers = #tpu.dot_dimension_numbers<[1], [0], [0], [1], [0, 0, 1, 1], [], []>} : vector<8x8xf32>, vector<8x8xf32>, vector<8x8xf32> -> vector<8x8xf32>
    %c8_85 = arith.constant 8 : index
    %c24_86 = arith.constant 24 : index
    %185 = vector.load %arg16[%c8_85, %c24_86] : memref<32x32xf32, #tpu.memory_space<vmem>>, vector<8x8xf32>
    tpu.vector_store %arg16[%c8_85, %c24_86], %184 {strides = array<i32>} : memref<32x32xf32, #tpu.memory_space<vmem>>, vector<8x8xf32>,
    %c2 = arith.constant 2 : index
    %c0_87 = arith.constant 0 : index
    %c0_88 = arith.constant 0 : index
    %186 = vector.load %arg4[%c2, %c0_87, %c0_88] : memref<4x8x8xf32, #tpu.memory_space<vmem>>, vector<1x8x8xf32>
    %187 = vector.shape_cast %186 : vector<1x8x8xf32> to vector<8x8xf32>
    %cst_89 = arith.constant 3.000000e-01 : f32
    %188 = vector.broadcast %cst_89 : f32 to vector<8x8xf32>
    %189 = arith.mulf %187, %188 : vector<8x8xf32>
    %190 = vector.extract_strided_slice %7 {offsets = [16, 0], sizes = [8, 8], strides = [1, 1]} : vector<32x32xf32> to vector<8x8xf32>
    %191 = vector.extract_strided_slice %12 {offsets = [16, 0], sizes = [8, 8], strides = [1, 1]} : vector<32x32xf32> to vector<8x8xf32>
    %192 = vector.extract_strided_slice %17 {offsets = [16, 0], sizes = [8, 8], strides = [1, 1]} : vector<32x32xf32> to vector<8x8xf32>
    %cst_90 = arith.constant dense<0.000000e+00> : vector<8x8xf32>
    %193 = tpu.matmul %190, %191, %cst_90 {dimension_numbers = #tpu.dot_dimension_numbers<[1], [1], [0], [0], [0, 0, 1, 0], [], []>} : vector<8x8xf32>, vector<8x8xf32>, vector<8x8xf32> -> vector<8x8xf32>
    %cst_91 = arith.constant 0.353553385 : f32
    %194 = vector.broadcast %cst_91 : f32 to vector<8x8xf32>
    %195 = arith.mulf %193, %194 : vector<8x8xf32>
    %cst_92 = arith.constant dense<0xFF800000> : vector<8xf32>
    %196 = vector.multi_reduction <maximumf>, %195, %cst_92 [1] : vector<8x8xf32> to vector<8xf32>
    %197 = vector.shape_cast %196 : vector<8xf32> to vector<8x1xf32>
    %198 = vector.broadcast %197 : vector<8x1xf32> to vector<8x8xf32>
    %199 = arith.subf %195, %198 : vector<8x8xf32>
    %200 = math.exp %199 : vector<8x8xf32>
    %cst_93 = arith.constant dense<0.000000e+00> : vector<8xf32>
    %201 = vector.multi_reduction <add>, %200, %cst_93 [1] : vector<8x8xf32> to vector<8xf32>
    %202 = vector.shape_cast %201 : vector<8xf32> to vector<8x1xf32>
    %cst_94 = arith.constant 0.699999988 : f32
    %203 = vector.broadcast %cst_94 : f32 to vector<8x1xf32>
    %204 = arith.divf %203, %202 : vector<8x1xf32>
    %205 = vector.broadcast %204 : vector<8x1xf32> to vector<8x8xf32>
    %206 = arith.mulf %200, %205 : vector<8x8xf32>
    %207 = arith.addf %206, %189 : vector<8x8xf32>
    %cst_95 = arith.constant dense<0.000000e+00> : vector<8x8xf32>
    %208 = tpu.matmul %207, %192, %cst_95 {dimension_numbers = #tpu.dot_dimension_numbers<[1], [0], [0], [1], [0, 0, 1, 1], [], []>} : vector<8x8xf32>, vector<8x8xf32>, vector<8x8xf32> -> vector<8x8xf32>
    %c16_96 = arith.constant 16 : index
    %c0_97 = arith.constant 0 : index
    %209 = vector.load %arg16[%c16_96, %c0_97] : memref<32x32xf32, #tpu.memory_space<vmem>>, vector<8x8xf32>
    tpu.vector_store %arg16[%c16_96, %c0_97], %208 {strides = array<i32>} : memref<32x32xf32, #tpu.memory_space<vmem>>, vector<8x8xf32>,
    %210 = vector.extract_strided_slice %7 {offsets = [16, 8], sizes = [8, 8], strides = [1, 1]} : vector<32x32xf32> to vector<8x8xf32>
    %211 = vector.extract_strided_slice %12 {offsets = [16, 8], sizes = [8, 8], strides = [1, 1]} : vector<32x32xf32> to vector<8x8xf32>
    %212 = vector.extract_strided_slice %17 {offsets = [16, 8], sizes = [8, 8], strides = [1, 1]} : vector<32x32xf32> to vector<8x8xf32>
    %cst_98 = arith.constant dense<0.000000e+00> : vector<8x8xf32>
    %213 = tpu.matmul %210, %211, %cst_98 {dimension_numbers = #tpu.dot_dimension_numbers<[1], [1], [0], [0], [0, 0, 1, 0], [], []>} : vector<8x8xf32>, vector<8x8xf32>, vector<8x8xf32> -> vector<8x8xf32>
    %cst_99 = arith.constant 0.353553385 : f32
    %214 = vector.broadcast %cst_99 : f32 to vector<8x8xf32>
    %215 = arith.mulf %213, %214 : vector<8x8xf32>
    %cst_100 = arith.constant dense<0xFF800000> : vector<8xf32>
    %216 = vector.multi_reduction <maximumf>, %215, %cst_100 [1] : vector<8x8xf32> to vector<8xf32>
    %217 = vector.shape_cast %216 : vector<8xf32> to vector<8x1xf32>
    %218 = vector.broadcast %217 : vector<8x1xf32> to vector<8x8xf32>
    %219 = arith.subf %215, %218 : vector<8x8xf32>
    %220 = math.exp %219 : vector<8x8xf32>
    %cst_101 = arith.constant dense<0.000000e+00> : vector<8xf32>
    %221 = vector.multi_reduction <add>, %220, %cst_101 [1] : vector<8x8xf32> to vector<8xf32>
    %222 = vector.shape_cast %221 : vector<8xf32> to vector<8x1xf32>
    %cst_102 = arith.constant 0.699999988 : f32
    %223 = vector.broadcast %cst_102 : f32 to vector<8x1xf32>
    %224 = arith.divf %223, %222 : vector<8x1xf32>
    %225 = vector.broadcast %224 : vector<8x1xf32> to vector<8x8xf32>
    %226 = arith.mulf %220, %225 : vector<8x8xf32>
    %227 = arith.addf %226, %189 : vector<8x8xf32>
    %cst_103 = arith.constant dense<0.000000e+00> : vector<8x8xf32>
    %228 = tpu.matmul %227, %212, %cst_103 {dimension_numbers = #tpu.dot_dimension_numbers<[1], [0], [0], [1], [0, 0, 1, 1], [], []>} : vector<8x8xf32>, vector<8x8xf32>, vector<8x8xf32> -> vector<8x8xf32>
    %c16_104 = arith.constant 16 : index
    %c8_105 = arith.constant 8 : index
    %229 = vector.load %arg16[%c16_104, %c8_105] : memref<32x32xf32, #tpu.memory_space<vmem>>, vector<8x8xf32>
    tpu.vector_store %arg16[%c16_104, %c8_105], %228 {strides = array<i32>} : memref<32x32xf32, #tpu.memory_space<vmem>>, vector<8x8xf32>,
    %230 = vector.extract_strided_slice %7 {offsets = [16, 16], sizes = [8, 8], strides = [1, 1]} : vector<32x32xf32> to vector<8x8xf32>
    %231 = vector.extract_strided_slice %12 {offsets = [16, 16], sizes = [8, 8], strides = [1, 1]} : vector<32x32xf32> to vector<8x8xf32>
    %232 = vector.extract_strided_slice %17 {offsets = [16, 16], sizes = [8, 8], strides = [1, 1]} : vector<32x32xf32> to vector<8x8xf32>
    %cst_106 = arith.constant dense<0.000000e+00> : vector<8x8xf32>
    %233 = tpu.matmul %230, %231, %cst_106 {dimension_numbers = #tpu.dot_dimension_numbers<[1], [1], [0], [0], [0, 0, 1, 0], [], []>} : vector<8x8xf32>, vector<8x8xf32>, vector<8x8xf32> -> vector<8x8xf32>
    %cst_107 = arith.constant 0.353553385 : f32
    %234 = vector.broadcast %cst_107 : f32 to vector<8x8xf32>
    %235 = arith.mulf %233, %234 : vector<8x8xf32>
    %cst_108 = arith.constant dense<0xFF800000> : vector<8xf32>
    %236 = vector.multi_reduction <maximumf>, %235, %cst_108 [1] : vector<8x8xf32> to vector<8xf32>
    %237 = vector.shape_cast %236 : vector<8xf32> to vector<8x1xf32>
    %238 = vector.broadcast %237 : vector<8x1xf32> to vector<8x8xf32>
    %239 = arith.subf %235, %238 : vector<8x8xf32>
    %240 = math.exp %239 : vector<8x8xf32>
    %cst_109 = arith.constant dense<0.000000e+00> : vector<8xf32>
    %241 = vector.multi_reduction <add>, %240, %cst_109 [1] : vector<8x8xf32> to vector<8xf32>
    %242 = vector.shape_cast %241 : vector<8xf32> to vector<8x1xf32>
    %cst_110 = arith.constant 0.699999988 : f32
    %243 = vector.broadcast %cst_110 : f32 to vector<8x1xf32>
    %244 = arith.divf %243, %242 : vector<8x1xf32>
    %245 = vector.broadcast %244 : vector<8x1xf32> to vector<8x8xf32>
    %246 = arith.mulf %240, %245 : vector<8x8xf32>
    %247 = arith.addf %246, %189 : vector<8x8xf32>
    %cst_111 = arith.constant dense<0.000000e+00> : vector<8x8xf32>
    %248 = tpu.matmul %247, %232, %cst_111 {dimension_numbers = #tpu.dot_dimension_numbers<[1], [0], [0], [1], [0, 0, 1, 1], [], []>} : vector<8x8xf32>, vector<8x8xf32>, vector<8x8xf32> -> vector<8x8xf32>
    %c16_112 = arith.constant 16 : index
    %c16_113 = arith.constant 16 : index
    %249 = vector.load %arg16[%c16_112, %c16_113] : memref<32x32xf32, #tpu.memory_space<vmem>>, vector<8x8xf32>
    tpu.vector_store %arg16[%c16_112, %c16_113], %248 {strides = array<i32>} : memref<32x32xf32, #tpu.memory_space<vmem>>, vector<8x8xf32>,
    %250 = vector.extract_strided_slice %7 {offsets = [16, 24], sizes = [8, 8], strides = [1, 1]} : vector<32x32xf32> to vector<8x8xf32>
    %251 = vector.extract_strided_slice %12 {offsets = [16, 24], sizes = [8, 8], strides = [1, 1]} : vector<32x32xf32> to vector<8x8xf32>
    %252 = vector.extract_strided_slice %17 {offsets = [16, 24], sizes = [8, 8], strides = [1, 1]} : vector<32x32xf32> to vector<8x8xf32>
    %cst_114 = arith.constant dense<0.000000e+00> : vector<8x8xf32>
    %253 = tpu.matmul %250, %251, %cst_114 {dimension_numbers = #tpu.dot_dimension_numbers<[1], [1], [0], [0], [0, 0, 1, 0], [], []>} : vector<8x8xf32>, vector<8x8xf32>, vector<8x8xf32> -> vector<8x8xf32>
    %cst_115 = arith.constant 0.353553385 : f32
    %254 = vector.broadcast %cst_115 : f32 to vector<8x8xf32>
    %255 = arith.mulf %253, %254 : vector<8x8xf32>
    %cst_116 = arith.constant dense<0xFF800000> : vector<8xf32>
    %256 = vector.multi_reduction <maximumf>, %255, %cst_116 [1] : vector<8x8xf32> to vector<8xf32>
    %257 = vector.shape_cast %256 : vector<8xf32> to vector<8x1xf32>
    %258 = vector.broadcast %257 : vector<8x1xf32> to vector<8x8xf32>
    %259 = arith.subf %255, %258 : vector<8x8xf32>
    %260 = math.exp %259 : vector<8x8xf32>
    %cst_117 = arith.constant dense<0.000000e+00> : vector<8xf32>
    %261 = vector.multi_reduction <add>, %260, %cst_117 [1] : vector<8x8xf32> to vector<8xf32>
    %262 = vector.shape_cast %261 : vector<8xf32> to vector<8x1xf32>
    %cst_118 = arith.constant 0.699999988 : f32
    %263 = vector.broadcast %cst_118 : f32 to vector<8x1xf32>
    %264 = arith.divf %263, %262 : vector<8x1xf32>
    %265 = vector.broadcast %264 : vector<8x1xf32> to vector<8x8xf32>
    %266 = arith.mulf %260, %265 : vector<8x8xf32>
    %267 = arith.addf %266, %189 : vector<8x8xf32>
    %cst_119 = arith.constant dense<0.000000e+00> : vector<8x8xf32>
    %268 = tpu.matmul %267, %252, %cst_119 {dimension_numbers = #tpu.dot_dimension_numbers<[1], [0], [0], [1], [0, 0, 1, 1], [], []>} : vector<8x8xf32>, vector<8x8xf32>, vector<8x8xf32> -> vector<8x8xf32>
    %c16_120 = arith.constant 16 : index
    %c24_121 = arith.constant 24 : index
    %269 = vector.load %arg16[%c16_120, %c24_121] : memref<32x32xf32, #tpu.memory_space<vmem>>, vector<8x8xf32>
    tpu.vector_store %arg16[%c16_120, %c24_121], %268 {strides = array<i32>} : memref<32x32xf32, #tpu.memory_space<vmem>>, vector<8x8xf32>,
    %c3 = arith.constant 3 : index
    %c0_122 = arith.constant 0 : index
    %c0_123 = arith.constant 0 : index
    %270 = vector.load %arg4[%c3, %c0_122, %c0_123] : memref<4x8x8xf32, #tpu.memory_space<vmem>>, vector<1x8x8xf32>
    %271 = vector.shape_cast %270 : vector<1x8x8xf32> to vector<8x8xf32>
    %cst_124 = arith.constant 3.000000e-01 : f32
    %272 = vector.broadcast %cst_124 : f32 to vector<8x8xf32>
    %273 = arith.mulf %271, %272 : vector<8x8xf32>
    %274 = vector.extract_strided_slice %7 {offsets = [24, 0], sizes = [8, 8], strides = [1, 1]} : vector<32x32xf32> to vector<8x8xf32>
    %275 = vector.extract_strided_slice %12 {offsets = [24, 0], sizes = [8, 8], strides = [1, 1]} : vector<32x32xf32> to vector<8x8xf32>
    %276 = vector.extract_strided_slice %17 {offsets = [24, 0], sizes = [8, 8], strides = [1, 1]} : vector<32x32xf32> to vector<8x8xf32>
    %cst_125 = arith.constant dense<0.000000e+00> : vector<8x8xf32>
    %277 = tpu.matmul %274, %275, %cst_125 {dimension_numbers = #tpu.dot_dimension_numbers<[1], [1], [0], [0], [0, 0, 1, 0], [], []>} : vector<8x8xf32>, vector<8x8xf32>, vector<8x8xf32> -> vector<8x8xf32>
    %cst_126 = arith.constant 0.353553385 : f32
    %278 = vector.broadcast %cst_126 : f32 to vector<8x8xf32>
    %279 = arith.mulf %277, %278 : vector<8x8xf32>
    %cst_127 = arith.constant dense<0xFF800000> : vector<8xf32>
    %280 = vector.multi_reduction <maximumf>, %279, %cst_127 [1] : vector<8x8xf32> to vector<8xf32>
    %281 = vector.shape_cast %280 : vector<8xf32> to vector<8x1xf32>
    %282 = vector.broadcast %281 : vector<8x1xf32> to vector<8x8xf32>
    %283 = arith.subf %279, %282 : vector<8x8xf32>
    %284 = math.exp %283 : vector<8x8xf32>
    %cst_128 = arith.constant dense<0.000000e+00> : vector<8xf32>
    %285 = vector.multi_reduction <add>, %284, %cst_128 [1] : vector<8x8xf32> to vector<8xf32>
    %286 = vector.shape_cast %285 : vector<8xf32> to vector<8x1xf32>
    %cst_129 = arith.constant 0.699999988 : f32
    %287 = vector.broadcast %cst_129 : f32 to vector<8x1xf32>
    %288 = arith.divf %287, %286 : vector<8x1xf32>
    %289 = vector.broadcast %288 : vector<8x1xf32> to vector<8x8xf32>
    %290 = arith.mulf %284, %289 : vector<8x8xf32>
    %291 = arith.addf %290, %273 : vector<8x8xf32>
    %cst_130 = arith.constant dense<0.000000e+00> : vector<8x8xf32>
    %292 = tpu.matmul %291, %276, %cst_130 {dimension_numbers = #tpu.dot_dimension_numbers<[1], [0], [0], [1], [0, 0, 1, 1], [], []>} : vector<8x8xf32>, vector<8x8xf32>, vector<8x8xf32> -> vector<8x8xf32>
    %c24_131 = arith.constant 24 : index
    %c0_132 = arith.constant 0 : index
    %293 = vector.load %arg16[%c24_131, %c0_132] : memref<32x32xf32, #tpu.memory_space<vmem>>, vector<8x8xf32>
    tpu.vector_store %arg16[%c24_131, %c0_132], %292 {strides = array<i32>} : memref<32x32xf32, #tpu.memory_space<vmem>>, vector<8x8xf32>,
    %294 = vector.extract_strided_slice %7 {offsets = [24, 8], sizes = [8, 8], strides = [1, 1]} : vector<32x32xf32> to vector<8x8xf32>
    %295 = vector.extract_strided_slice %12 {offsets = [24, 8], sizes = [8, 8], strides = [1, 1]} : vector<32x32xf32> to vector<8x8xf32>
    %296 = vector.extract_strided_slice %17 {offsets = [24, 8], sizes = [8, 8], strides = [1, 1]} : vector<32x32xf32> to vector<8x8xf32>
    %cst_133 = arith.constant dense<0.000000e+00> : vector<8x8xf32>
    %297 = tpu.matmul %294, %295, %cst_133 {dimension_numbers = #tpu.dot_dimension_numbers<[1], [1], [0], [0], [0, 0, 1, 0], [], []>} : vector<8x8xf32>, vector<8x8xf32>, vector<8x8xf32> -> vector<8x8xf32>
    %cst_134 = arith.constant 0.353553385 : f32
    %298 = vector.broadcast %cst_134 : f32 to vector<8x8xf32>
    %299 = arith.mulf %297, %298 : vector<8x8xf32>
    %cst_135 = arith.constant dense<0xFF800000> : vector<8xf32>
    %300 = vector.multi_reduction <maximumf>, %299, %cst_135 [1] : vector<8x8xf32> to vector<8xf32>
    %301 = vector.shape_cast %300 : vector<8xf32> to vector<8x1xf32>
    %302 = vector.broadcast %301 : vector<8x1xf32> to vector<8x8xf32>
    %303 = arith.subf %299, %302 : vector<8x8xf32>
    %304 = math.exp %303 : vector<8x8xf32>
    %cst_136 = arith.constant dense<0.000000e+00> : vector<8xf32>
    %305 = vector.multi_reduction <add>, %304, %cst_136 [1] : vector<8x8xf32> to vector<8xf32>
    %306 = vector.shape_cast %305 : vector<8xf32> to vector<8x1xf32>
    %cst_137 = arith.constant 0.699999988 : f32
    %307 = vector.broadcast %cst_137 : f32 to vector<8x1xf32>
    %308 = arith.divf %307, %306 : vector<8x1xf32>
    %309 = vector.broadcast %308 : vector<8x1xf32> to vector<8x8xf32>
    %310 = arith.mulf %304, %309 : vector<8x8xf32>
    %311 = arith.addf %310, %273 : vector<8x8xf32>
    %cst_138 = arith.constant dense<0.000000e+00> : vector<8x8xf32>
    %312 = tpu.matmul %311, %296, %cst_138 {dimension_numbers = #tpu.dot_dimension_numbers<[1], [0], [0], [1], [0, 0, 1, 1], [], []>} : vector<8x8xf32>, vector<8x8xf32>, vector<8x8xf32> -> vector<8x8xf32>
    %c24_139 = arith.constant 24 : index
    %c8_140 = arith.constant 8 : index
    %313 = vector.load %arg16[%c24_139, %c8_140] : memref<32x32xf32, #tpu.memory_space<vmem>>, vector<8x8xf32>
    tpu.vector_store %arg16[%c24_139, %c8_140], %312 {strides = array<i32>} : memref<32x32xf32, #tpu.memory_space<vmem>>, vector<8x8xf32>,
    %314 = vector.extract_strided_slice %7 {offsets = [24, 16], sizes = [8, 8], strides = [1, 1]} : vector<32x32xf32> to vector<8x8xf32>
    %315 = vector.extract_strided_slice %12 {offsets = [24, 16], sizes = [8, 8], strides = [1, 1]} : vector<32x32xf32> to vector<8x8xf32>
    %316 = vector.extract_strided_slice %17 {offsets = [24, 16], sizes = [8, 8], strides = [1, 1]} : vector<32x32xf32> to vector<8x8xf32>
    %cst_141 = arith.constant dense<0.000000e+00> : vector<8x8xf32>
    %317 = tpu.matmul %314, %315, %cst_141 {dimension_numbers = #tpu.dot_dimension_numbers<[1], [1], [0], [0], [0, 0, 1, 0], [], []>} : vector<8x8xf32>, vector<8x8xf32>, vector<8x8xf32> -> vector<8x8xf32>
    %cst_142 = arith.constant 0.353553385 : f32
    %318 = vector.broadcast %cst_142 : f32 to vector<8x8xf32>
    %319 = arith.mulf %317, %318 : vector<8x8xf32>
    %cst_143 = arith.constant dense<0xFF800000> : vector<8xf32>
    %320 = vector.multi_reduction <maximumf>, %319, %cst_143 [1] : vector<8x8xf32> to vector<8xf32>
    %321 = vector.shape_cast %320 : vector<8xf32> to vector<8x1xf32>
    %322 = vector.broadcast %321 : vector<8x1xf32> to vector<8x8xf32>
    %323 = arith.subf %319, %322 : vector<8x8xf32>
    %324 = math.exp %323 : vector<8x8xf32>
    %cst_144 = arith.constant dense<0.000000e+00> : vector<8xf32>
    %325 = vector.multi_reduction <add>, %324, %cst_144 [1] : vector<8x8xf32> to vector<8xf32>
    %326 = vector.shape_cast %325 : vector<8xf32> to vector<8x1xf32>
    %cst_145 = arith.constant 0.699999988 : f32
    %327 = vector.broadcast %cst_145 : f32 to vector<8x1xf32>
    %328 = arith.divf %327, %326 : vector<8x1xf32>
    %329 = vector.broadcast %328 : vector<8x1xf32> to vector<8x8xf32>
    %330 = arith.mulf %324, %329 : vector<8x8xf32>
    %331 = arith.addf %330, %273 : vector<8x8xf32>
    %cst_146 = arith.constant dense<0.000000e+00> : vector<8x8xf32>
    %332 = tpu.matmul %331, %316, %cst_146 {dimension_numbers = #tpu.dot_dimension_numbers<[1], [0], [0], [1], [0, 0, 1, 1], [], []>} : vector<8x8xf32>, vector<8x8xf32>, vector<8x8xf32> -> vector<8x8xf32>
    %c24_147 = arith.constant 24 : index
    %c16_148 = arith.constant 16 : index
    %333 = vector.load %arg16[%c24_147, %c16_148] : memref<32x32xf32, #tpu.memory_space<vmem>>, vector<8x8xf32>
    tpu.vector_store %arg16[%c24_147, %c16_148], %332 {strides = array<i32>} : memref<32x32xf32, #tpu.memory_space<vmem>>, vector<8x8xf32>,
    %334 = vector.extract_strided_slice %7 {offsets = [24, 24], sizes = [8, 8], strides = [1, 1]} : vector<32x32xf32> to vector<8x8xf32>
    %335 = vector.extract_strided_slice %12 {offsets = [24, 24], sizes = [8, 8], strides = [1, 1]} : vector<32x32xf32> to vector<8x8xf32>
    %336 = vector.extract_strided_slice %17 {offsets = [24, 24], sizes = [8, 8], strides = [1, 1]} : vector<32x32xf32> to vector<8x8xf32>
    %cst_149 = arith.constant dense<0.000000e+00> : vector<8x8xf32>
    %337 = tpu.matmul %334, %335, %cst_149 {dimension_numbers = #tpu.dot_dimension_numbers<[1], [1], [0], [0], [0, 0, 1, 0], [], []>} : vector<8x8xf32>, vector<8x8xf32>, vector<8x8xf32> -> vector<8x8xf32>
    %cst_150 = arith.constant 0.353553385 : f32
    %338 = vector.broadcast %cst_150 : f32 to vector<8x8xf32>
    %339 = arith.mulf %337, %338 : vector<8x8xf32>
    %cst_151 = arith.constant dense<0xFF800000> : vector<8xf32>
    %340 = vector.multi_reduction <maximumf>, %339, %cst_151 [1] : vector<8x8xf32> to vector<8xf32>
    %341 = vector.shape_cast %340 : vector<8xf32> to vector<8x1xf32>
    %342 = vector.broadcast %341 : vector<8x1xf32> to vector<8x8xf32>
    %343 = arith.subf %339, %342 : vector<8x8xf32>
    %344 = math.exp %343 : vector<8x8xf32>
    %cst_152 = arith.constant dense<0.000000e+00> : vector<8xf32>
    %345 = vector.multi_reduction <add>, %344, %cst_152 [1] : vector<8x8xf32> to vector<8xf32>
    %346 = vector.shape_cast %345 : vector<8xf32> to vector<8x1xf32>
    %cst_153 = arith.constant 0.699999988 : f32
    %347 = vector.broadcast %cst_153 : f32 to vector<8x1xf32>
    %348 = arith.divf %347, %346 : vector<8x1xf32>
    %349 = vector.broadcast %348 : vector<8x1xf32> to vector<8x8xf32>
    %350 = arith.mulf %344, %349 : vector<8x8xf32>
    %351 = arith.addf %350, %273 : vector<8x8xf32>
    %cst_154 = arith.constant dense<0.000000e+00> : vector<8x8xf32>
    %352 = tpu.matmul %351, %336, %cst_154 {dimension_numbers = #tpu.dot_dimension_numbers<[1], [0], [0], [1], [0, 0, 1, 1], [], []>} : vector<8x8xf32>, vector<8x8xf32>, vector<8x8xf32> -> vector<8x8xf32>
    %c24_155 = arith.constant 24 : index
    %c24_156 = arith.constant 24 : index
    %353 = vector.load %arg16[%c24_155, %c24_156] : memref<32x32xf32, #tpu.memory_space<vmem>>, vector<8x8xf32>
    tpu.vector_store %arg16[%c24_155, %c24_156], %352 {strides = array<i32>} : memref<32x32xf32, #tpu.memory_space<vmem>>, vector<8x8xf32>,
    %c0_157 = arith.constant 0 : index
    %c0_158 = arith.constant 0 : index
    %354 = vector.load %arg16[%c0_157, %c0_158] : memref<32x32xf32, #tpu.memory_space<vmem>>, vector<32x32xf32>
    %c0_159 = arith.constant 0 : index
    %c0_160 = arith.constant 0 : index
    %355 = vector.load %arg11[%c0_159, %c0_160] : memref<32x32xf32, #tpu.memory_space<vmem>>, vector<32x32xf32>
    %cst_161 = arith.constant dense<0.000000e+00> : vector<32x32xf32>
    %356 = tpu.matmul %354, %355, %cst_161 {dimension_numbers = #tpu.dot_dimension_numbers<[1], [0], [0], [1], [0, 0, 1, 1], [], []>} : vector<32x32xf32>, vector<32x32xf32>, vector<32x32xf32> -> vector<32x32xf32>
    %c0_162 = arith.constant 0 : index
    %c0_163 = arith.constant 0 : index
    %357 = vector.load %arg12[%c0_162, %c0_163] : memref<1x32xf32, #tpu.memory_space<vmem>>, vector<1x32xf32>
    %358 = vector.broadcast %357 : vector<1x32xf32> to vector<32x32xf32>
    %359 = arith.addf %356, %358 : vector<32x32xf32>
    %360 = arith.addf %359, %2 : vector<32x32xf32>
    %cst_164 = arith.constant dense<0.000000e+00> : vector<32xf32>
    %361 = vector.multi_reduction <add>, %360, %cst_164 [1] : vector<32x32xf32> to vector<32xf32>
    %362 = vector.shape_cast %361 : vector<32xf32> to vector<32x1xf32>
    %cst_165 = arith.constant 3.200000e+01 : f32
    %363 = vector.broadcast %cst_165 : f32 to vector<32x1xf32>
    %364 = arith.divf %362, %363 : vector<32x1xf32>
    %365 = arith.mulf %360, %360 : vector<32x32xf32>
    %cst_166 = arith.constant dense<0.000000e+00> : vector<32xf32>
    %366 = vector.multi_reduction <add>, %365, %cst_166 [1] : vector<32x32xf32> to vector<32xf32>
    %367 = vector.shape_cast %366 : vector<32xf32> to vector<32x1xf32>
    %cst_167 = arith.constant 3.200000e+01 : f32
    %368 = vector.broadcast %cst_167 : f32 to vector<32x1xf32>
    %369 = arith.divf %367, %368 : vector<32x1xf32>
    %370 = arith.mulf %364, %364 : vector<32x1xf32>
    %371 = arith.subf %369, %370 : vector<32x1xf32>
    %372 = vector.broadcast %364 : vector<32x1xf32> to vector<32x32xf32>
    %373 = arith.subf %360, %372 : vector<32x32xf32>
    %cst_168 = arith.constant 9.99999974E-6 : f32
    %374 = vector.broadcast %cst_168 : f32 to vector<32x1xf32>
    %375 = arith.addf %371, %374 : vector<32x1xf32>
    %376 = math.rsqrt %375 : vector<32x1xf32>
    %377 = vector.broadcast %376 : vector<32x1xf32> to vector<32x32xf32>
    %378 = arith.mulf %373, %377 : vector<32x32xf32>
    %c0_169 = arith.constant 0 : index
    %c0_170 = arith.constant 0 : index
    %379 = vector.load %arg13[%c0_169, %c0_170] : memref<1x32xf32, #tpu.memory_space<vmem>>, vector<1x32xf32>
    %380 = vector.broadcast %379 : vector<1x32xf32> to vector<32x32xf32>
    %381 = arith.mulf %378, %380 : vector<32x32xf32>
    %c0_171 = arith.constant 0 : index
    %c0_172 = arith.constant 0 : index
    %382 = vector.load %arg14[%c0_171, %c0_172] : memref<1x32xf32, #tpu.memory_space<vmem>>, vector<1x32xf32>
    %383 = vector.broadcast %382 : vector<1x32xf32> to vector<32x32xf32>
    %384 = arith.addf %381, %383 : vector<32x32xf32>
    %385 = vector.extract_strided_slice %384 {offsets = [0, 0], sizes = [8, 32], strides = [1, 1]} : vector<32x32xf32> to vector<8x32xf32>
    %386 = vector.extract_strided_slice %384 {offsets = [8, 0], sizes = [8, 32], strides = [1, 1]} : vector<32x32xf32> to vector<8x32xf32>
    %387 = vector.extract_strided_slice %384 {offsets = [16, 0], sizes = [8, 32], strides = [1, 1]} : vector<32x32xf32> to vector<8x32xf32>
    %388 = vector.extract_strided_slice %384 {offsets = [24, 0], sizes = [8, 32], strides = [1, 1]} : vector<32x32xf32> to vector<8x32xf32>
    %389 = tpu.concatenate %385, %386, %387, %388 in 1 : vector<8x32xf32>, vector<8x32xf32>, vector<8x32xf32>, vector<8x32xf32> -> vector<8x128xf32>
    %c0_173 = arith.constant 0 : index
    %c0_174 = arith.constant 0 : index
    %c0_175 = arith.constant 0 : index
    %390 = vector.load %arg15[%c0_173, %c0_174, %c0_175] : memref<1x8x128xf32, #tpu.memory_space<vmem>>, vector<1x8x128xf32>
    %391 = vector.shape_cast %390 : vector<1x8x128xf32> to vector<8x128xf32>
    %392 = vector.shape_cast %389 : vector<8x128xf32> to vector<1x8x128xf32>
    tpu.vector_store %arg15[%c0_173, %c0_174, %c0_175], %392 {strides = array<i32>} : memref<1x8x128xf32, #tpu.memory_space<vmem>>, vector<1x8x128xf32>,
    return
  }
  func.func @transform_0(%arg0: i32) -> (i32, i32) {
    %c0_i32 = arith.constant 0 : i32
    %c0_i32_0 = arith.constant 0 : i32
    return %arg0, %c0_i32 : i32, i32
  }
  func.func @transform_1(%arg0: i32) -> (i32, i32) {
    %c0_i32 = arith.constant 0 : i32
    %c0_i32_0 = arith.constant 0 : i32
    return %arg0, %c0_i32 : i32, i32
  }
  func.func @transform_2(%arg0: i32) -> (i32, i32) {
    %c0_i32 = arith.constant 0 : i32
    %c0_i32_0 = arith.constant 0 : i32
    return %arg0, %c0_i32 : i32, i32
  }
  func.func @transform_3(%arg0: i32) -> (i32, i32, i32) {
    %c0_i32 = arith.constant 0 : i32
    %c0_i32_0 = arith.constant 0 : i32
    %c0_i32_1 = arith.constant 0 : i32
    return %arg0, %c0_i32, %c0_i32_0 : i32, i32, i32
  }
  func.func @transform_4(%arg0: i32) -> (i32, i32) {
    %c0_i32 = arith.constant 0 : i32
    %c0_i32_0 = arith.constant 0 : i32
    %c0_i32_1 = arith.constant 0 : i32
    return %c0_i32, %c0_i32_0 : i32, i32
  }
  func.func @transform_5(%arg0: i32) -> (i32, i32) {
    %c0_i32 = arith.constant 0 : i32
    %c0_i32_0 = arith.constant 0 : i32
    %c0_i32_1 = arith.constant 0 : i32
    return %c0_i32, %c0_i32_0 : i32, i32
  }
  func.func @transform_6(%arg0: i32) -> (i32, i32) {
    %c0_i32 = arith.constant 0 : i32
    %c0_i32_0 = arith.constant 0 : i32
    %c0_i32_1 = arith.constant 0 : i32
    return %c0_i32, %c0_i32_0 : i32, i32
  }
  func.func @transform_7(%arg0: i32) -> (i32, i32) {
    %c0_i32 = arith.constant 0 : i32
    %c0_i32_0 = arith.constant 0 : i32
    %c0_i32_1 = arith.constant 0 : i32
    return %c0_i32, %c0_i32_0 : i32, i32
  }
  func.func @transform_8(%arg0: i32) -> (i32, i32) {
    %c0_i32 = arith.constant 0 : i32
    %c0_i32_0 = arith.constant 0 : i32
    %c0_i32_1 = arith.constant 0 : i32
    return %c0_i32, %c0_i32_0 : i32, i32
  }
  func.func @transform_9(%arg0: i32) -> (i32, i32) {
    %c0_i32 = arith.constant 0 : i32
    %c0_i32_0 = arith.constant 0 : i32
    %c0_i32_1 = arith.constant 0 : i32
    return %c0_i32, %c0_i32_0 : i32, i32
  }
  func.func @transform_10(%arg0: i32) -> (i32, i32) {
    %c0_i32 = arith.constant 0 : i32
    %c0_i32_0 = arith.constant 0 : i32
    %c0_i32_1 = arith.constant 0 : i32
    return %c0_i32, %c0_i32_0 : i32, i32
  }
  func.func @transform_11(%arg0: i32) -> (i32, i32) {
    %c0_i32 = arith.constant 0 : i32
    %c0_i32_0 = arith.constant 0 : i32
    %c0_i32_1 = arith.constant 0 : i32
    return %c0_i32, %c0_i32_0 : i32, i32
  }
  func.func @transform_12(%arg0: i32) -> (i32, i32) {
    %c0_i32 = arith.constant 0 : i32
    %c0_i32_0 = arith.constant 0 : i32
    %c0_i32_1 = arith.constant 0 : i32
    return %c0_i32, %c0_i32_0 : i32, i32
  }
  func.func @transform_13(%arg0: i32) -> (i32, i32) {
    %c0_i32 = arith.constant 0 : i32
    %c0_i32_0 = arith.constant 0 : i32
    %c0_i32_1 = arith.constant 0 : i32
    return %c0_i32, %c0_i32_0 : i32, i32
  }
  func.func @transform_14(%arg0: i32) -> (i32, i32, i32) {
    %c0_i32 = arith.constant 0 : i32
    %c0_i32_0 = arith.constant 0 : i32
    %c0_i32_1 = arith.constant 0 : i32
    return %arg0, %c0_i32, %c0_i32_0 : i32, i32, i32
  }
}

</mosaic_0001>

<bundles_post_ra>
// kernel: tpu_custom_call.1
= control target key start
LH: loop header
LB: loop body
LE: loop exit
PB: predicated region body
PF: predicated region fallthrough
CT: control target
= control target key end

     0   :  { %s5290_s0 = inlined_call_operand.vmem [shape: f32[64,32], index: 0, kind: input, shape index: {}]   ;;  %s5291_s1 = inlined_call_operand.vmem [shape: f32[64,32], index: 1, kind: input, shape index: {}]   ;;  %s5292_s2 = inlined_call_operand.vmem [shape: f32[64,32], index: 2, kind: input, shape index: {}]   ;;  %s5293_s3 = inlined_call_operand.vmem [shape: f32[8,8,8], index: 3, kind: input, shape index: {}]   ;;  %s5294_s4 = inlined_call_operand.vmem [shape: f32[32,32], index: 4, kind: input, shape index: {}]   ;;  %s5295_s5 = inlined_call_operand.vmem [shape: f32[32,32], index: 5, kind: input, shape index: {}]   ;;  %s5296_s6 = inlined_call_operand.vmem [shape: f32[32,32], index: 6, kind: input, shape index: {}]   ;;  %s5297_s7 = inlined_call_operand.vmem [shape: f32[1,32], index: 7, kind: input, shape index: {}]   ;;  %s5298_s8 = inlined_call_operand.vmem [shape: f32[1,32], index: 8, kind: input, shape index: {}]   ;;  %s5299_s9 = inlined_call_operand.vmem [shape: f32[1,32], index: 9, kind: input, shape index: {}]   ;;  %s5300_s10 = inlined_call_operand.vmem [shape: f32[32,32], index: 10, kind: input, shape index: {}]   ;;  %s5301_s11 = inlined_call_operand.vmem [shape: f32[1,32], index: 11, kind: input, shape index: {}]   ;;  %s5302_s12 = inlined_call_operand.vmem [shape: f32[1,32], index: 12, kind: input, shape index: {}]   ;;  %s5303_s13 = inlined_call_operand.vmem [shape: f32[1,32], index: 13, kind: input, shape index: {}]   ;;  %s5304_s14 = inlined_call_operand.hbm [shape: f32[2,8,128], index: 14, kind: output, shape index: {}]  }
   0x1   :  { %5308 = sst [smem:[#allocation9_spill]] %s5290_s0 }
   0x2   :  { %19 = vsyncpa [#allocation4], 0 }
   0x3   :  { %21 = vsyncpa [#allocation4 + $0x1], 0  ;;  %s4625_s29 = smov 0   ;;  %s4627_s30 = smov 0  }
   0x4   :  { %s4629_s15 = smov 0   ;;  %s4631_s16 = smov 0  }
   0x5 LB: > { %5309 = sst [smem:[#allocation6_spill]] %s4532_s15  ;;  %s4646_s17 = sadd.s32 4294967295, %s4536_s16   ;;  %s4536_s16 = sphi %s4631_s16, %s5315_s16   ;;  %s4532_s15 = sphi %s4629_s15, %s5317_s15   ;;  %s4528_s30 = sphi %s4627_s30, %s5319_s30   ;;  %s4524_s29 = sphi %s4625_s29, %s5318_s29  }
   0x6   : > { %s3948_s18 = sadd.s32 4294967294, %s4536_s16   ;;  %s4650_s19 = sadd.s32 1, %s4536_s16  }
   0x7   : > { %5310 = sst [smem:[#allocation7_spill]] %s4650_s19  ;;  %s348_s20 = sadd.s32 1, %s4532_s15 }
   0x8   : > { %s345_s21 = ssub.s32 %s4536_s16, %s4650_s19  ;;  %p358_p0 = scmp.ne.s32.totalorder %s4532_s15, %s4528_s30 }
   0x9   : > { %p346_p1 = scmp.eq.s32.totalorder %s345_s21, 0  ;;  %p359_p2 = scmp.eq.s32.totalorder %s4646_s17, 1 }
   0xa   : > { %p364_p3 = scmp.ne.s32.totalorder %s4528_s30, %s4524_s29  ;;  %p365_p4 = scmp.eq.s32.totalorder %s3948_s18, 1 }
   0xb   : > { %s4661_s22 = scalar_select %p346_p1, %s4532_s15, %s348_s20  }
   0xc   : > { %p4663_p5 = por %p359_p2, %p358_p0  ;;  %p4667_p6 = por %p365_p4, %p364_p3 }
   0xd   : > { %5311 = sst [smem:[#allocation8_spill]] %s4661_s22  ;;  %p3951_p7 = scmp.ge.s32.totalorder %s4536_s16, 1 }
   0xe   : > { %p449_p8 = scmp.lt.s32.totalorder %s4536_s16, 3 }
  0x10   : > { %p450_p9 = pnand %p3951_p7, %p449_p8 }
  0x11   : > { %s3953_s18 = sshll.u32 (!%p450_p9), %s4646_s17, 2  ;;  %s5314_s0 = sld [smem:[#allocation9_spill]] (!%p450_p9) }
  0x12   : > { %453 = sbr.rel (%p450_p9) target bundleno = 1829 (0x725), region = 76  ;;  %p511_p10 = scmp.lt.s32.totalorder (!%p450_p9), %s3953_s18, 7 }
  0x13   : > { %s4541_s26 = smov (!%p450_p9), 120   ;;  %s4546_s21 = smov (!%p450_p9), 32  }
  0x17   : > { %v549_v0 = vld [vmem:[%s5294_s4 + $0x18] sm:$0xff]  ;;  %v548_v1 = vld [vmem:[%s5294_s4 + $0x10] sm:$0xff]  ;;  %v547_v2 = vld [vmem:[%s5294_s4 + $0x8] sm:$0xff]  ;;  %s5321_s18 = smov (!%p511_p10, %s3953_s18), 7  ;;  %vm557_vm0 = vcmask 261120   ;;  %v4538_v22 = vmov 0.0  }
  0x18   : > { %4134 = vmatprep.subr.mxu1 %v549_v0  ;;  %v766_v3 = vld [vmem:[%s5296_s6 + $0x18] sm:$0xff]  ;;  %v765_v4 = vld [vmem:[%s5296_s6 + $0x10] sm:$0xff]  ;;  %v546_v5 = vld [vmem:[%s5294_s4] sm:$0xff]  ;;  %s4695_s15 = sshll.u32 %s5321_s18, 3  ;;  %vm4539_vm1 = vmmov 0   ;;  %vm873_vm2 = vcmask 64512  }
  0x19   : > { %4135 = vmatpush3.msra.mxu1 %v549_v0  ;;  %4162 = vmatprep.subr.mxu0 %v766_v3  ;;  %v764_v6 = vld [vmem:[%s5296_s6 + $0x8] sm:$0xff]  ;;  %s514_s25 = scalar_lea.vmem %s5314_s0, %s4695_s15  ;;  %v658_v7 = vld [vmem:[%s5295_s5 + $0x18] sm:$0xff]  ;;  %v657_v11 = vld [vmem:[%s5295_s5 + $0x10] sm:$0xff]  ;;  %s520_s22 = scalar_lea.vmem %s5291_s1, %s4695_s15  ;;  %vm1211_vm3 = vcmask 130112   ;;  %vm1385_vm4 = vcmask 195712   ;;  %vm1559_vm5 = vcmask 261312  }
  0x1a   : > { %4136 = vmatprep.subr.mxu1 %v548_v1  ;;  %4163 = vmatpush3.msra.mxu0 %v766_v3  ;;  %v534_v8 = vld [vmem:[%s514_s25] sm:$0xff]  ;;  %v535_v9 = vld [vmem:[%s514_s25 + $0x8] sm:$0xff]  ;;  %v536_v10 = vld [vmem:[%s514_s25 + $0x10] sm:$0xff]  ;;  %s4724_s28 = scalar_lea.vmem %s5292_s2, %s4695_s15  ;;  %s4542_s18 = smov 104   ;;  %vm3834_vm6 = vcmask 523264   ;;  %vm3836_vm7 = vcmask 785408  }
  0x1b   : > { %4137 = vmatpush3.msra.mxu1 %v548_v1  ;;  %4164 = vmatprep.subr.mxu0 %v765_v4  ;;  %v763_v12 = vld [vmem:[%s5296_s6] sm:$0xff]  ;;  %v537_v13 = vld [vmem:[%s514_s25 + $0x18] sm:$0xff]  ;;  %v656_v14 = vld [vmem:[%s5295_s5 + $0x8] sm:$0xff]  ;;  %s5032_s27 = scalar_lea.vmem %s5293_s3, %s4695_s15  ;;  %s4543_s15 = smov 8  }
  0x1c   : > { %4138 = vmatprep.subr.mxu1 %v547_v2  ;;  %4165 = vmatpush3.msra.mxu0 %v765_v4  ;;  %v538_v15 = vld [vmem:[%s520_s22] sm:$0xff]  ;;  %v539_v18 = vld [vmem:[%s520_s22 + $0x8] sm:$0xff]  ;;  %v540_v20 = vld [vmem:[%s520_s22 + $0x10] sm:$0xff]  ;;  %s4547_s0 = smov 64   ;;  %s4548_s25 = smov 96  }
  0x1d   : > { %4139 = vmatpush3.msra.mxu1 %v547_v2  ;;  %4166 = vmatprep.subr.mxu0 %v764_v6  ;;  %v655_v16 = vld [vmem:[%s5295_s5] sm:$0xff]  ;;  %v543_v19 = vld [vmem:[%s4724_s28 + $0x8] sm:$0xff]  ;;  %v541_v21 = vld [vmem:[%s520_s22 + $0x18] sm:$0xff]  ;;  %s4540_s22 = smov 112  }
  0x1e   : > { %4140 = vmatprep.subr.mxu1 %v546_v5  ;;  %4142 = vmatprep.mubr.msk.f32.mxu1 %vm557_vm0, %v534_v8  ;;  %v542_v17 = vld [vmem:[%s4724_s28] sm:$0xff]  ;;  %v544_v23 = vld [vmem:[%s4724_s28 + $0x10] sm:$0xff]  ;;  %v545_v24 = vld [vmem:[%s4724_s28 + $0x18] sm:$0xff] }
  0x1f   : > { %4141 = vmatpush3.msra.mxu1 %v546_v5  ;;  %4167 = vmatpush3.msra.mxu0 %v764_v6  ;;  %v3966_v30 = vld [vmem:[%s5298_s8] ss:$0 sm:$0xff] }
  0x20   : > { %4143 = vmatmul.mubr.msk.f32.vlgmr.msra.gmra.mxu1 %vm557_vm0, %v535_v9  ;;  %4148 = vmatprep.subr.mxu1 %v658_v7  ;;  %v3961_v33 = vld [vmem:[%s5297_s7] ss:$0 sm:$0xff] }
  0x21   : > { %4149 = vmatpush3.msra.mxu1 %v658_v7  ;;  %4145 = vmatprep.mubr.msk.f32.mxu1 %vm557_vm0, %v536_v10  ;;  %v4786_v42 = vld [vmem:[%s5299_s9] ss:$0 sm:$0xff] }
  0x22   : > { %4150 = vmatprep.subr.mxu1 %v657_v11  ;;  %4168 = vmatprep.subr.mxu0 %v763_v12 }
  0x23   : > { %4151 = vmatpush3.msra.mxu1 %v657_v11  ;;  %4169 = vmatpush3.msra.mxu0 %v763_v12 }
  0x24   : > { %4146 = vmatmul.mubr.msk.f32.gmra.mxu1 %vm557_vm0, %v537_v13  ;;  %4152 = vmatprep.subr.mxu1 %v656_v14 }
  0x25   : > { %4153 = vmatpush3.msra.mxu1 %v656_v14  ;;  %4156 = vmatprep.mubr.msk.f32.mxu1 %vm557_vm0, %v538_v15 }
  0x26   : > { %4154 = vmatprep.subr.mxu1 %v655_v16  ;;  %4170 = vmatprep.mubr.msk.f32.mxu0 %vm557_vm0, %v542_v17 }
  0x27   : > { %4155 = vmatpush3.msra.mxu1 %v655_v16  ;;  %4171 = vmatmul.mubr.msk.f32.vlgmr.msra.gmra.mxu0 %vm557_vm0, %v543_v19 }
  0x28   : > { %4157 = vmatmul.mubr.msk.f32.vlgmr.msra.gmra.mxu1 %vm557_vm0, %v539_v18  ;;  %4176 = vmatprep.subr.mxu1 %v4538_v22 }
  0x29   : > { %4159 = vmatprep.mubr.msk.f32.mxu1 %vm557_vm0, %v540_v20  ;;  %4186 = vmatprep.subr.mxu0 %v4538_v22 }
  0x2a   : > { %4173 = vmatprep.mubr.msk.f32.mxu0 %vm557_vm0, %v544_v23 }
  0x2b   : > { %4174 = vmatmul.mubr.msk.f32.gmra.mxu0 %vm557_vm0, %v545_v24 }
  0x2c   : > { %4160 = vmatmul.mubr.msk.f32.gmra.mxu1 %vm557_vm0, %v541_v21  ;;  %4188 = vmatprep.mubr.msk.f32.mxu0 %vm4539_vm1, %v4538_v22 }
  0x2d   : > { %4178 = vmatprep.mubr.msk.f32.mxu1 %vm4539_vm1, %v4538_v22 }
  0xe0   : > { %v4144_v25 = vpop.f32.mrf.mxu1 }
  0xe1   : > { %v642_v35 = vadd.f32 %v4144_v25, %v3961_v33 }
  0xe2   : > { %v636_v26 = vpop.f32.mrf.mxu1 }
  0xe3   : > { %v637_v34 = vadd.f32 %v3961_v33, %v636_v26 }
  0xe4   : > { %v4147_v27 = vpop.f32.mrf.mxu1 }
  0xe5   : > { %v4792_v44 = vadd.f32 %v4147_v27, %v3961_v33 }
  0xe6   : > { %v646_v28 = vpop.f32.mrf.mxu1 }
  0xe7   : > { %v4773_v40 = vadd.f32 %v3961_v33, %v646_v28  ;;  %v4172_v41 = vpop.f32.mrf.mxu0 }
  0xe8   : > { %v4158_v29 = vpop.f32.mrf.mxu1  ;;  %v4812_v47 = vadd.f32 %v4172_v41, %v4786_v42 }
  0xe9   : > { %v750_v36 = vadd.f32 %v4158_v29, %v3966_v30  ;;  %v852_v43 = vpop.f32.mrf.mxu0 }
  0xea   : > { %v744_v31 = vpop.f32.mrf.mxu1  ;;  %v853_v45 = vadd.f32 %v4786_v42, %v852_v43 }
  0xeb   : > { %v745_v32 = vadd.f32 %v3966_v30, %v744_v31  ;;  %v4897_v12 = vpop.f32.mrf.mxu0 }
  0xec   : > { %v4161_v37 = vpop.f32.mrf.mxu1 }
  0xed   : > { %1215 = vrot.lane.b32.xlu1 %v745_v32, %s4540_s22  ;;  %1040 = vrot.lane.b32.xlu0 %v745_v32, %s4541_s26  ;;  %v4795_v46 = vadd.f32 %v4161_v37, %v3966_v30  ;;  %v4899_v13 = vpop.f32.mrf.mxu0 }
  0xee   : > { %4177 = vmatpush3.xpose.msk.msra.mxu1 %vm873_vm2, %v745_v32  ;;  %v754_v38 = vpop.f32.mrf.mxu1 }
  0xef   : > { %4181 = vmatprep.subr.mxu1 %v4538_v22  ;;  %v4771_v39 = vadd.f32 %v3966_v30, %v754_v38 }
  0xf1   : > { %4179 = vmatmul.mubr.msk.f32.vlgmr.msra.gmra.mxu1 %vm873_vm2, %v637_v34  ;;  %1213 = vrot.lane.b32.xlu1 %v637_v34, %s4540_s22 }
  0xf2   : > { %1038 = vrot.lane.b32.xlu0 %v637_v34, %s4541_s26  ;;  %4183 = vmatprep.mubr.msk.f32.mxu1 %vm4539_vm1, %v4538_v22 }
  0xf3   : > { %4182 = vmatpush3.msra.mxu1 %v853_v45 }
  0xf4   : > { %4191 = vmatprep.subr.mxu1 %v4538_v22 }
  0xf5   : > { %1387 = vrot.lane.b32.xlu1 %v637_v34, %s4542_s18 }
  0xf6   : > { %1389 = vrot.lane.b32.xlu0 %v745_v32, %s4542_s18 }
  0xf9   : > { %1728 = vrot.lane.b32.xlu1 %v642_v35, %s4541_s26 }
  0xfa   : > { %1730 = vrot.lane.b32.xlu0 %v750_v36, %s4541_s26 }
  0xfd   : > { %1902 = vrot.lane.b32.xlu1 %v642_v35, %s4540_s22 }
  0xfe   : > { %1904 = vrot.lane.b32.xlu0 %v750_v36, %s4540_s22 }
 0x101   : > { %2075 = vrot.lane.b32.xlu1 %v642_v35, %s4542_s18 }
 0x102   : > { %2077 = vrot.lane.b32.xlu0 %v750_v36, %s4542_s18 }
 0x105   : > { %2415 = vrot.lane.b32.xlu1 %v4773_v40, %s4541_s26 }
 0x106   : > { %2417 = vrot.lane.b32.xlu0 %v4771_v39, %s4541_s26 }
 0x109   : > { %2589 = vrot.lane.b32.xlu1 %v4773_v40, %s4540_s22 }
 0x10a   : > { %2591 = vrot.lane.b32.xlu0 %v4771_v39, %s4540_s22 }
 0x10d   : > { %2762 = vrot.lane.b32.xlu1 %v4773_v40, %s4542_s18 }
 0x10e   : > { %2764 = vrot.lane.b32.xlu0 %v4771_v39, %s4542_s18 }
 0x111   : > { %3102 = vrot.lane.b32.xlu1 %v4792_v44, %s4541_s26 }
 0x112   : > { %3104 = vrot.lane.b32.xlu0 %v4795_v46, %s4541_s26 }
 0x115   : > { %3276 = vrot.lane.b32.xlu1 %v4792_v44, %s4540_s22 }
 0x116   : > { %3278 = vrot.lane.b32.xlu0 %v4795_v46, %s4540_s22 }
 0x119   : > { %3449 = vrot.lane.b32.xlu1 %v4792_v44, %s4542_s18 }
 0x11a   : > { %3451 = vrot.lane.b32.xlu0 %v4795_v46, %s4542_s18 }
 0x11d   : > { %1305 = vrot.lane.b32.xlu1 %v853_v45, %s4540_s22 }
 0x11e   : > { %1131 = vrot.lane.b32.xlu0 %v853_v45, %s4541_s26 }
 0x121   : > { %1479 = vrot.lane.b32.xlu1 %v853_v45, %s4542_s18 }
 0x122   : > { %1821 = vrot.lane.b32.xlu0 %v4812_v47, %s4541_s26 }
 0x125   : > { %1994 = vrot.lane.b32.xlu1 %v4812_v47, %s4540_s22 }
 0x15f   : > { %v1216_v48 = vpop.permute.xlu1 %1215  ;;  %v1041_v49 = vpop.permute.xlu0 %1040 }
 0x160   : > { %4187 = vmatpush3.xpose.msk.msra.mxu0 %vm873_vm2, %v1041_v49 }
 0x161   : > { %4196 = vmatprep.subr.mxu0 %v4538_v22 }
 0x163   : > { %v1214_v50 = vpop.permute.xlu1 %1213 }
 0x164   : > { %v1039_v51 = vpop.permute.xlu0 %1038 }
 0x165   : > { %4189 = vmatmul.mubr.msk.f32.vlgmr.msra.gmra.mxu0 %vm873_vm2, %v1039_v51 }
 0x166   : > { %4197 = vmatpush3.xpose.msk.msra.mxu0 %vm873_vm2, %v1216_v48  ;;  %4198 = vmatprep.mubr.msk.f32.mxu0 %vm4539_vm1, %v4538_v22 }
 0x167   : > { %v1388_v52 = vpop.permute.xlu1 %1387  ;;  %4206 = vmatprep.subr.mxu0 %v4538_v22 }
 0x168   : > { %v1390_v53 = vpop.permute.xlu0 %1389 }
 0x169   : > { %4199 = vmatmul.mubr.msk.f32.vlgmr.msra.gmra.mxu0 %vm873_vm2, %v1214_v50 }
 0x16a   : > { %4207 = vmatpush3.xpose.msk.msra.mxu0 %vm873_vm2, %v1390_v53  ;;  %4208 = vmatprep.mubr.msk.f32.mxu0 %vm4539_vm1, %v4538_v22 }
 0x16b   : > { %4216 = vmatprep.subr.mxu0 %v4538_v22  ;;  %v1729_v54 = vpop.permute.xlu1 %1728 }
 0x16c   : > { %v1731_v55 = vpop.permute.xlu0 %1730 }
 0x16d   : > { %4209 = vmatmul.mubr.msk.f32.vlgmr.msra.gmra.mxu0 %vm873_vm2, %v1388_v52 }
 0x16e   : > { %4217 = vmatpush3.xpose.msk.msra.mxu0 %vm873_vm2, %v750_v36  ;;  %4218 = vmatprep.mubr.msk.f32.mxu0 %vm4539_vm1, %v4538_v22 }
 0x16f   : > { %4226 = vmatprep.subr.mxu0 %v4538_v22  ;;  %v1903_v57 = vpop.permute.xlu1 %1902 }
 0x170   : > { %v1905_v56 = vpop.permute.xlu0 %1904 }
 0x171   : > { %4219 = vmatmul.mubr.msk.f32.vlgmr.msra.gmra.mxu0 %vm873_vm2, %v642_v35 }
 0x172   : > { %4227 = vmatpush3.xpose.msk.msra.mxu0 %vm873_vm2, %v1731_v55  ;;  %4228 = vmatprep.mubr.msk.f32.mxu0 %vm4539_vm1, %v4538_v22 }
 0x173   : > { %4236 = vmatprep.subr.mxu0 %v4538_v22  ;;  %v2076_v59 = vpop.permute.xlu1 %2075 }
 0x174   : > { %v2078_v58 = vpop.permute.xlu0 %2077 }
 0x175   : > { %4229 = vmatmul.mubr.msk.f32.vlgmr.msra.gmra.mxu0 %vm873_vm2, %v1729_v54 }
 0x176   : > { %4237 = vmatpush3.xpose.msk.msra.mxu0 %vm873_vm2, %v1905_v56  ;;  %4238 = vmatprep.mubr.msk.f32.mxu0 %vm4539_vm1, %v4538_v22 }
 0x177   : > { %4246 = vmatprep.subr.mxu0 %v4538_v22  ;;  %v2416_v61 = vpop.permute.xlu1 %2415 }
 0x178   : > { %v2418_v60 = vpop.permute.xlu0 %2417 }
 0x179   : > { %4239 = vmatmul.mubr.msk.f32.vlgmr.msra.gmra.mxu0 %vm873_vm2, %v1903_v57 }
 0x17a   : > { %4247 = vmatpush3.xpose.msk.msra.mxu0 %vm873_vm2, %v2078_v58  ;;  %4248 = vmatprep.mubr.msk.f32.mxu0 %vm4539_vm1, %v4538_v22 }
 0x17b   : > { %4256 = vmatprep.subr.mxu0 %v4538_v22  ;;  %v2590_v63 = vpop.permute.xlu1 %2589 }
 0x17c   : > { %v2592_v62 = vpop.permute.xlu0 %2591 }
 0x17d   : > { %4249 = vmatmul.mubr.msk.f32.vlgmr.msra.gmra.mxu0 %vm873_vm2, %v2076_v59 }
 0x17e   : > { %4257 = vmatpush3.xpose.msk.msra.mxu0 %vm873_vm2, %v4771_v39  ;;  %4258 = vmatprep.mubr.msk.f32.mxu0 %vm4539_vm1, %v4538_v22 }
 0x17f   : > { %4266 = vmatprep.subr.mxu0 %v4538_v22  ;;  %v2763_v1 = vpop.permute.xlu1 %2762 }
 0x180   : > { %v2765_v0 = vpop.permute.xlu0 %2764 }
 0x181   : > { %4259 = vmatmul.mubr.msk.f32.vlgmr.msra.gmra.mxu0 %vm873_vm2, %v4773_v40 }
 0x182   : > { %4267 = vmatpush3.xpose.msk.msra.mxu0 %vm873_vm2, %v2418_v60  ;;  %4268 = vmatprep.mubr.msk.f32.mxu0 %vm4539_vm1, %v4538_v22 }
 0x183   : > { %4276 = vmatprep.subr.mxu0 %v4538_v22  ;;  %v3103_v3 = vpop.permute.xlu1 %3102 }
 0x184   : > { %v3105_v2 = vpop.permute.xlu0 %3104 }
 0x185   : > { %4269 = vmatmul.mubr.msk.f32.vlgmr.msra.gmra.mxu0 %vm873_vm2, %v2416_v61 }
 0x186   : > { %4277 = vmatpush3.xpose.msk.msra.mxu0 %vm873_vm2, %v2592_v62  ;;  %4278 = vmatprep.mubr.msk.f32.mxu0 %vm4539_vm1, %v4538_v22 }
 0x187   : > { %4286 = vmatprep.subr.mxu0 %v4538_v22  ;;  %v3277_v5 = vpop.permute.xlu1 %3276 }
 0x188   : > { %v3279_v4 = vpop.permute.xlu0 %3278 }
 0x189   : > { %4279 = vmatmul.mubr.msk.f32.vlgmr.msra.gmra.mxu0 %vm873_vm2, %v2590_v63 }
 0x18a   : > { %4287 = vmatpush3.xpose.msk.msra.mxu0 %vm873_vm2, %v2765_v0  ;;  %4288 = vmatprep.mubr.msk.f32.mxu0 %vm4539_vm1, %v4538_v22 }
 0x18b   : > { %4296 = vmatprep.subr.mxu0 %v4538_v22  ;;  %v3450_v7 = vpop.permute.xlu1 %3449 }
 0x18c   : > { %v3452_v6 = vpop.permute.xlu0 %3451 }
 0x18d   : > { %4289 = vmatmul.mubr.msk.f32.vlgmr.msra.gmra.mxu0 %vm873_vm2, %v2763_v1 }
 0x18e   : > { %4297 = vmatpush3.xpose.msk.msra.mxu0 %vm873_vm2, %v4795_v46  ;;  %4298 = vmatprep.mubr.msk.f32.mxu0 %vm4539_vm1, %v4538_v22 }
 0x18f   : > { %4306 = vmatprep.subr.mxu0 %v4538_v22 }
 0x190   : > { %v4915_v30 = vpop.permute.xlu0 %1131 }
 0x191   : > { %4299 = vmatmul.mubr.msk.f32.vlgmr.msra.gmra.mxu0 %vm873_vm2, %v4792_v44 }
 0x192   : > { %4307 = vmatpush3.xpose.msk.msra.mxu0 %vm873_vm2, %v3105_v2  ;;  %4308 = vmatprep.mubr.msk.f32.mxu0 %vm4539_vm1, %v4538_v22 }
 0x193   : > { %4316 = vmatprep.subr.mxu0 %v4538_v22 }
 0x194   : > { %v4923_v37 = vpop.permute.xlu0 %1821 }
 0x195   : > { %4309 = vmatmul.mubr.msk.f32.vlgmr.msra.gmra.mxu0 %vm873_vm2, %v3103_v3 }
 0x196   : > { %4317 = vmatpush3.xpose.msk.msra.mxu0 %vm873_vm2, %v3279_v4  ;;  %4318 = vmatprep.mubr.msk.f32.mxu0 %vm4539_vm1, %v4538_v22 }
 0x197   : > { %4326 = vmatprep.subr.mxu0 %v4538_v22 }
 0x199   : > { %4319 = vmatmul.mubr.msk.f32.vlgmr.msra.gmra.mxu0 %vm873_vm2, %v3277_v5 }
 0x19a   : > { %4327 = vmatpush3.xpose.msk.msra.mxu0 %vm873_vm2, %v3452_v6  ;;  %4328 = vmatprep.mubr.msk.f32.mxu0 %vm4539_vm1, %v4538_v22 }
 0x19d   : > { %4329 = vmatmul.mubr.msk.f32.vlgmr.msra.gmra.mxu0 %vm873_vm2, %v3450_v7 }
 0x1b1   : > { %v946_v8 = vpop.f32.mrf.mxu1 }
 0x1b2   : > { %v950_v9 = vmul.f32 0.35355338, %v946_v8 }
 0x1b3   : > { %v4180_v10 = vpop.f32.mrf.mxu1 }
 0x1b4   : > { %v951_v11 = vsel %vm873_vm2, %v950_v9, -inf }
 0x1b5   : > { %952 = vmax.xlane.f32.xlu0 %v951_v11 }
 0x225   : > { %v1112_v14 = vpop.f32.mrf.mxu0 }
 0x226   : > { %v4901_v15 = vmul.f32 0.35355338, %v1112_v14 }
 0x227   : > { %v4190_v16 = vpop.f32.mrf.mxu0 }
 0x228   : > { %v1117_v17 = vsel %vm873_vm2, %v4901_v15, -inf }
 0x229   : > { %1118 = vmax.xlane.f32.xlu1 %v1117_v17  ;;  %v1287_v18 = vpop.f32.mrf.mxu0 }
 0x22a   : > { %v4905_v19 = vmul.f32 0.35355338, %v1287_v18 }
 0x22b   : > { %v4200_v20 = vpop.f32.mrf.mxu0 }
 0x22c   : > { %v1292_v21 = vsel %vm873_vm2, %v4905_v19, -inf }
 0x22d   : > { %v1461_v23 = vpop.f32.mrf.mxu0  ;;  %1293 = vmax.xlane.f32.xlu0 %v1292_v21 }
 0x22e   : > { %v4909_v24 = vmul.f32 0.35355338, %v1461_v23  ;;  %v4967_v23 = vadd.f32 %v4786_v42, %v4899_v13 }
 0x22f   : > { %v4210_v25 = vpop.f32.mrf.mxu0 }
 0x230   : > { %v1466_v26 = vsel %vm873_vm2, %v4909_v24, -inf }
 0x231   : > { %v1636_v27 = vpop.f32.mrf.mxu0  ;;  %1467 = vmax.xlane.f32.xlu0 %v1466_v26 }
 0x232   : > { %v4913_v28 = vmul.f32 0.35355338, %v1636_v27  ;;  %v4977_v27 = vpop.permute.xlu1 %1305 }
 0x233   : > { %v4220_v29 = vpop.f32.mrf.mxu0 }
 0x234   : > { %v1641_v31 = vsel %vm873_vm2, %v4913_v28, -inf }
 0x235   : > { %1642 = vmax.xlane.f32.xlu1 %v1641_v31  ;;  %v1802_v32 = vpop.f32.mrf.mxu0 }
 0x236   : > { %v4919_v33 = vmul.f32 0.35355338, %v1802_v32  ;;  %v4979_v29 = vpop.permute.xlu1 %1479 }
 0x237   : > { %v4230_v34 = vpop.f32.mrf.mxu0 }
 0x238   : > { %v1807_v35 = vsel %vm873_vm2, %v4919_v33, -inf }
 0x239   : > { %v1976_v36 = vpop.f32.mrf.mxu0  ;;  %1808 = vmax.xlane.f32.xlu0 %v1807_v35 }
 0x23a   : > { %v4925_v38 = vmul.f32 0.35355338, %v1976_v36  ;;  %v4981_v31 = vpop.permute.xlu1 %1994 }
 0x23b   : > { %v4240_v39 = vpop.f32.mrf.mxu0 }
 0x23c   : > { %v1981_v40 = vsel %vm873_vm2, %v4925_v38, -inf }
 0x23d   : > { %1982 = vmax.xlane.f32.xlu1 %v1981_v40  ;;  %v2149_v41 = vpop.f32.mrf.mxu0 }
 0x23e   : > { %v4929_v43 = vmul.f32 0.35355338, %v2149_v41  ;;  %v953_v44 = vpop.xlane.xlu0 %952 }
 0x23f   : > { %v954_v45 = vsub.f32 %v950_v9, %v953_v44  ;;  %v4250_v46 = vpop.f32.mrf.mxu0 }
 0x240   : > { %v2154_v48 = vsel %vm873_vm2, %v4929_v43, -inf }
 0x241   : > { %v955_v49 = vmul.f32 1.442695, %v954_v45  ;;  %v2323_v50 = vpop.f32.mrf.mxu0  ;;  %2155 = vmax.xlane.f32.xlu0 %v2154_v48 }
 0x242   : > { %v4933_v51 = vmul.f32 0.35355338, %v2323_v50 }
 0x243   : > { %4400 = vpow2.f32 %v955_v49  ;;  %v4260_v52 = vpop.f32.mrf.mxu0 }
 0x244   : > { %v2328_v53 = vsel %vm873_vm2, %v4933_v51, -inf }
 0x245   : > { %2329 = vmax.xlane.f32.xlu1 %v2328_v53  ;;  %v2489_v54 = vpop.f32.mrf.mxu0 }
 0x246   : > { %v4937_v55 = vmul.f32 0.35355338, %v2489_v54 }
 0x247   : > { %v4270_v56 = vpop.f32.mrf.mxu0 }
 0x248   : > { %v2494_v57 = vsel %vm873_vm2, %v4937_v55, -inf }
 0x249   : > { %v2663_v58 = vpop.f32.mrf.mxu0  ;;  %2495 = vmax.xlane.f32.xlu0 %v2494_v57 }
 0x24a   : > { %v4941_v59 = vmul.f32 0.35355338, %v2663_v58 }
 0x24b   : > { %v4280_v60 = vpop.f32.mrf.mxu0 }
 0x24c   : > { %v2668_v61 = vsel %vm873_vm2, %v4941_v59, -inf }
 0x24d   : > { %2669 = vmax.xlane.f32.xlu1 %v2668_v61  ;;  %v2836_v62 = vpop.f32.mrf.mxu0 }
 0x24e   : > { %v4945_v63 = vmul.f32 0.35355338, %v2836_v62 }
 0x24f   : > { %v4290_v0 = vpop.f32.mrf.mxu0 }
 0x250   : > { %v4947_v1 = vpop.eup %4400  ;;  %v2841_v2 = vsel %vm873_vm2, %v4945_v63, -inf }
 0x251   : > { %v3010_v3 = vpop.f32.mrf.mxu0  ;;  %2842 = vmax.xlane.f32.xlu0 %v2841_v2  ;;  %v957_v4 = vsel %vm873_vm2, %v4947_v1, 0.0 }
 0x252   : > { %v4953_v5 = vmul.f32 0.35355338, %v3010_v3  ;;  %958 = vadd.xlane.f32.xlu1 %v957_v4 }
 0x253   : > { %v4300_v6 = vpop.f32.mrf.mxu0 }
 0x254   : > { %v3015_v7 = vsel %vm873_vm2, %v4953_v5, -inf }
 0x255   : > { %v3176_v8 = vpop.f32.mrf.mxu0 }
 0x256   : > { %v4957_v9 = vmul.f32 0.35355338, %v3176_v8  ;;  %3016 = vmax.xlane.f32.xlu1 %v3015_v7 }
 0x257   : > { %v4310_v10 = vpop.f32.mrf.mxu0 }
 0x258   : > { %v3181_v11 = vsel %vm873_vm2, %v4957_v9, -inf }
 0x259   : > { %v3350_v14 = vpop.f32.mrf.mxu0  ;;  %3182 = vmax.xlane.f32.xlu0 %v3181_v11 }
 0x25a   : > { %v4961_v16 = vmul.f32 0.35355338, %v3350_v14 }
 0x25b   : > { %v4320_v17 = vpop.f32.mrf.mxu0 }
 0x25c   : > { %v3355_v18 = vsel %vm873_vm2, %v4961_v16, -inf }
 0x25d   : > { %v3523_v20 = vpop.f32.mrf.mxu0  ;;  %3356 = vmax.xlane.f32.xlu1 %v3355_v18 }
 0x25e   : > { %v4973_v25 = vmul.f32 0.35355338, %v3523_v20 }
 0x25f   : > { %v4330_v21 = vpop.f32.mrf.mxu0 }
 0x260   : > { %v3528_v26 = vsel %vm873_vm2, %v4973_v25, -inf }
 0x26e   : > { %2167 = vrot.lane.b32.xlu1 %v4812_v47, %s4542_s18 }
 0x26f   : > { %2508 = vrot.lane.b32.xlu0 %v4967_v23, %s4541_s26 }
 0x28e   : > { %3529 = vmax.xlane.f32.xlu0 %v3528_v26 }
 0x2b2   : > { %v1119_v13 = vpop.xlane.xlu1 %1118 }
 0x2b3   : > { %v1120_v32 = vsub.f32 %v4901_v15, %v1119_v13 }
 0x2b5   : > { %v1121_v34 = vmul.f32 1.442695, %v1120_v32 }
 0x2b6   : > { %v1294_v35 = vpop.xlane.xlu0 %1293 }
 0x2b7   : > { %4402 = vpow2.f32 %v1121_v34  ;;  %v1295_v36 = vsub.f32 %v4905_v19, %v1294_v35  ;;  %v871_v35 = vld [vmem:[%s5032_s27] sm:$0xff] }
 0x2b9   : > { %v1296_v39 = vmul.f32 1.442695, %v1295_v36 }
 0x2ba   : > { %v1468_v40 = vpop.xlane.xlu0 %1467 }
 0x2bb   : > { %4404 = vpow2.f32 %v1296_v39  ;;  %v1469_v41 = vsub.f32 %v4909_v24, %v1468_v40 }
 0x2bd   : > { %v1470_v44 = vmul.f32 1.442695, %v1469_v41  ;;  %v5041_v41 = vmul.f32 0.3, %v871_v35  ;;  %v3988_v35 = vld [vmem:[%s5032_s27 + $0x8] sm:$0xff] }
 0x2be   : > { %v1643_v45 = vpop.xlane.xlu1 %1642 }
 0x2bf   : > { %4406 = vpow2.f32 %v1470_v44  ;;  %v1644_v46 = vsub.f32 %v4913_v28, %v1643_v45 }
 0x2c1   : > { %v1645_v48 = vmul.f32 1.442695, %v1644_v46 }
 0x2c2   : > { %v1809_v49 = vpop.xlane.xlu0 %1808 }
 0x2c3   : > { %4408 = vpow2.f32 %v1645_v48  ;;  %v1810_v15 = vsub.f32 %v4919_v33, %v1809_v49 }
 0x2c4   : > { %v4988_v50 = vpop.eup %4402 }
 0x2c5   : > { %v1811_v52 = vmul.f32 1.442695, %v1810_v15  ;;  %v1123_v19 = vsel %vm873_vm2, %v4988_v50, 0.0 }
 0x2c6   : > { %v1983_v53 = vpop.xlane.xlu1 %1982  ;;  %1124 = vadd.xlane.f32.xlu0 %v1123_v19 }
 0x2c7   : > { %4410 = vpow2.f32 %v1811_v52  ;;  %v1984_v24 = vsub.f32 %v4925_v38, %v1983_v53 }
 0x2c8   : > { %v4993_v54 = vpop.eup %4404 }
 0x2c9   : > { %v1985_v56 = vmul.f32 1.442695, %v1984_v24  ;;  %v1298_v28 = vsel %vm873_vm2, %v4993_v54, 0.0 }
 0x2ca   : > { %1299 = vadd.xlane.f32.xlu1 %v1298_v28  ;;  %v2156_v57 = vpop.xlane.xlu0 %2155 }
 0x2cb   : > { %4412 = vpow2.f32 %v1985_v56  ;;  %v2157_v33 = vsub.f32 %v4929_v43, %v2156_v57 }
 0x2cc   : > { %v4998_v58 = vpop.eup %4406 }
 0x2cd   : > { %v2158_v60 = vmul.f32 1.442695, %v2157_v33  ;;  %v1472_v61 = vsel %vm873_vm2, %v4998_v58, 0.0 }
 0x2ce   : > { %v2330_v62 = vpop.xlane.xlu1 %2329  ;;  %1473 = vadd.xlane.f32.xlu0 %v1472_v61 }
 0x2cf   : > { %4414 = vpow2.f32 %v2158_v60  ;;  %v2331_v38 = vsub.f32 %v4933_v51, %v2330_v62 }
 0x2d0   : > { %v5003_v0 = vpop.eup %4408 }
 0x2d1   : > { %v2332_v2 = vmul.f32 1.442695, %v2331_v38  ;;  %v1647_v3 = vsel %vm873_vm2, %v5003_v0, 0.0 }
 0x2d2   : > { %1648 = vadd.xlane.f32.xlu1 %v1647_v3  ;;  %v2496_v4 = vpop.xlane.xlu0 %2495 }
 0x2d3   : > { %4416 = vpow2.f32 %v2332_v2  ;;  %v2497_v43 = vsub.f32 %v4937_v55, %v2496_v4 }
 0x2d4   : > { %v5008_v6 = vpop.eup %4410 }
 0x2d5   : > { %v2498_v7 = vmul.f32 1.442695, %v2497_v43  ;;  %v1813_v8 = vsel %vm873_vm2, %v5008_v6, 0.0 }
 0x2d6   : > { %v2670_v10 = vpop.xlane.xlu1 %2669  ;;  %1814 = vadd.xlane.f32.xlu0 %v1813_v8 }
 0x2d7   : > { %4418 = vpow2.f32 %v2498_v7  ;;  %v2671_v51 = vsub.f32 %v4941_v59, %v2670_v10 }
 0x2d8   : > { %v5013_v11 = vpop.eup %4412 }
 0x2d9   : > { %v2672_v14 = vmul.f32 1.442695, %v2671_v51  ;;  %v1987_v17 = vsel %vm873_vm2, %v5013_v11, 0.0 }
 0x2da   : > { %1988 = vadd.xlane.f32.xlu1 %v1987_v17  ;;  %v2843_v55 = vpop.xlane.xlu0 %2842 }
 0x2db   : > { %4420 = vpow2.f32 %v2672_v14  ;;  %v2844_v18 = vsub.f32 %v4945_v63, %v2843_v55  ;;  %v959_v20 = vpop.xlane.xlu1 %958 }
 0x2dc   : > { %v5018_v21 = vpop.eup %4414  ;;  %4422 = vrcp.f32 %v959_v20 }
 0x2dd   : > { %v2845_v26 = vmul.f32 1.442695, %v2844_v18  ;;  %v2160_v59 = vsel %vm873_vm2, %v5018_v21, 0.0 }
 0x2de   : > { %2161 = vadd.xlane.f32.xlu0 %v2160_v59 }
 0x2df   : > { %4424 = vpow2.f32 %v2845_v26 }
 0x2e0   : > { %v5022_v13 = vpop.eup %4416 }
 0x2e1   : > { %v2334_v32 = vsel %vm873_vm2, %v5022_v13, 0.0 }
 0x2e2   : > { %2335 = vadd.xlane.f32.xlu1 %v2334_v32  ;;  %v3183_v52 = vpop.xlane.xlu0 %3182 }
 0x2e3   : > { %v3184_v53 = vsub.f32 %v4957_v9, %v3183_v52 }
 0x2e4   : > { %v5026_v34 = vpop.eup %4418 }
 0x2e5   : > { %v2500_v63 = vsel %vm873_vm2, %v5026_v34, 0.0 }
 0x2e6   : > { %2501 = vadd.xlane.f32.xlu1 %v2500_v63  ;;  %v5060_v24 = vpop.permute.xlu0 %2508 }
 0x2e8   : > { %v5037_v36 = vpop.eup %4420 }
 0x2e9   : > { %v4423_v39 = vpop.eup %4422  ;;  %v2674_v40 = vsel %vm873_vm2, %v5037_v36, 0.0 }
 0x2ea   : > { %v961_v44 = vmul.f32 0.7, %v4423_v39  ;;  %2675 = vadd.xlane.f32.xlu0 %v2674_v40 }
 0x2ec   : > { %v5043_v45 = vpop.eup %4424  ;;  %v962_v46 = vmul.f32 %v4947_v1, %v961_v44  ;;  %v3017_v1 = vpop.xlane.xlu1 %3016  ;;  %v1563_v44 = vmul.f32 0.3, %v3988_v35 }
 0x2ed   : > { %v2847_v48 = vsel %vm873_vm2, %v5043_v45, 0.0  ;;  %v3018_v15 = vsub.f32 %v4953_v5, %v3017_v1 }
 0x2ee   : > { %v963_v49 = vadd.f32 %v962_v46, %v5041_v41  ;;  %2848 = vadd.xlane.f32.xlu1 %v2847_v48 }
 0x2ef   : > { %v3019_v19 = vmul.f32 1.442695, %v3018_v15 }
 0x2f0   : > { %4184 = vmatmul.mubr.msk.f32.vlgmr.msra.gmra.mxu1 %vm873_vm2, %v963_v49  ;;  %v3357_v38 = vpop.xlane.xlu1 %3356 }
 0x2f1   : > { %4192 = vmatpush3.msra.mxu1 %v4915_v30  ;;  %4193 = vmatprep.mubr.msk.f32.mxu1 %vm4539_vm1, %v4538_v22  ;;  %4426 = vpow2.f32 %v3019_v19  ;;  %v3185_v30 = vmul.f32 1.442695, %v3184_v53  ;;  %v3358_v2 = vsub.f32 %v4961_v16, %v3357_v38 }
 0x2f2   : > { %4201 = vmatprep.subr.mxu1 %v4538_v22 }
 0x2f3   : > { %4428 = vpow2.f32 %v3185_v30  ;;  %v3359_v3 = vmul.f32 1.442695, %v3358_v2 }
 0x2f4   : > { %v5084_v4 = vpop.permute.xlu1 %2167 }
 0x2fe   : > { %v5063_v33 = vpop.eup %4426 }
 0x2ff   : > { %2681 = vrot.lane.b32.xlu1 %v4967_v23, %s4540_s22  ;;  %v3021_v60 = vsel %vm873_vm2, %v5063_v33, 0.0 }
 0x300   : > { %2854 = vrot.lane.b32.xlu0 %v4967_v23, %s4542_s18  ;;  %v5067_v5 = vpop.eup %4428 }
 0x301   : > { %v3187_v9 = vsel %vm873_vm2, %v5067_v5, 0.0 }
 0x317   : > { %v3530_v56 = vpop.xlane.xlu0 %3529 }
 0x318   : > { %v3531_v28 = vsub.f32 %v4973_v25, %v3530_v56  ;;  %v5077_v25 = vadd.f32 %v4897_v12, %v4786_v42  ;;  %v4001_v56 = vld [vmem:[%s5032_s27 + $0x10] sm:$0xff] }
 0x31a   : > { %v3532_v57 = vmul.f32 1.442695, %v3531_v28 }
 0x31c   : > { %4430 = vpow2.f32 %v3532_v57 }
 0x31d   : > { %4432 = vpow2.f32 %v3359_v3 }
 0x31f   : > { %3022 = vadd.xlane.f32.xlu0 %v3021_v60  ;;  %v2250_v60 = vmul.f32 0.3, %v4001_v56 }
 0x323   : > { %3188 = vadd.xlane.f32.xlu1 %v3187_v9 }
 0x329   : > { %v5071_v61 = vpop.eup %4430 }
 0x32a   : > { %v3534_v62 = vsel %vm873_vm2, %v5071_v61, 0.0  ;;  %v5086_v7 = vpop.eup %4432 }
 0x32b   : > { %3535 = vadd.xlane.f32.xlu1 %v3534_v62  ;;  %v3361_v42 = vsel %vm873_vm2, %v5086_v7, 0.0 }
 0x335   : > { %3195 = vrot.lane.b32.xlu0 %v5077_v25, %s4541_s26  ;;  %s4545_s26 = smov 24  }
 0x33c   : > { %3541 = vrot.lane.b32.xlu1 %v5077_v25, %s4542_s18 }
 0x34f   : > { %v1125_v43 = vpop.xlane.xlu0 %1124 }
 0x350   : > { %4434 = vrcp.f32 %v1125_v43 }
 0x353   : > { %v1300_v8 = vpop.xlane.xlu1 %1299 }
 0x354   : > { %4436 = vrcp.f32 %v1300_v8  ;;  %3362 = vadd.xlane.f32.xlu0 %v3361_v42 }
 0x357   : > { %v1474_v12 = vpop.xlane.xlu0 %1473 }
 0x358   : > { %4438 = vrcp.f32 %v1474_v12 }
 0x35b   : > { %v1649_v16 = vpop.xlane.xlu1 %1648 }
 0x35c   : > { %4440 = vrcp.f32 %v1649_v16 }
 0x35d   : > { %v4435_v10 = vpop.eup %4434 }
 0x35e   : > { %v1127_v51 = vmul.f32 0.7, %v4435_v10 }
 0x35f   : > { %v1815_v14 = vpop.xlane.xlu0 %1814 }
 0x360   : > { %v1128_v17 = vmul.f32 %v4988_v50, %v1127_v51  ;;  %4442 = vrcp.f32 %v1815_v14 }
 0x361   : > { %v4437_v55 = vpop.eup %4436 }
 0x362   : > { %v1129_v18 = vadd.f32 %v1128_v17, %v5041_v41  ;;  %v1302_v20 = vmul.f32 0.7, %v4437_v55  ;;  %v4014_v17 = vld [vmem:[%s5032_s27 + $0x18] sm:$0xff]  ;;  %s507_s27 = sand.u32 1, %s4528_s30  }
 0x363   : > { %v1989_v26 = vpop.xlane.xlu1 %1988  ;;  %s3952_s19 = sshll.u32 %s507_s27, 3 }
 0x364   : > { %v1303_v59 = vmul.f32 %v4993_v54, %v1302_v20  ;;  %4444 = vrcp.f32 %v1989_v26  ;;  %4194 = vmatmul.mubr.msk.f32.vlgmr.msra.gmra.mxu1 %vm873_vm2, %v1129_v18  ;;  %v2937_v18 = vmul.f32 0.3, %v4014_v17 }
 0x365   : > { %v4439_v32 = vpop.eup %4438  ;;  %4202 = vmatpush3.msra.mxu1 %v4977_v27  ;;  %4203 = vmatprep.mubr.msk.f32.mxu1 %vm4539_vm1, %v4538_v22 }
 0x366   : > { %v1304_v63 = vadd.f32 %v1303_v59, %v5041_v41  ;;  %v1476_v50 = vmul.f32 0.7, %v4439_v32  ;;  %4211 = vmatprep.subr.mxu1 %v4538_v22 }
 0x367   : > { %v2162_v39 = vpop.xlane.xlu0 %2161 }
 0x368   : > { %v1477_v40 = vmul.f32 %v4998_v58, %v1476_v50  ;;  %4446 = vrcp.f32 %v2162_v39  ;;  %4204 = vmatmul.mubr.msk.f32.vlgmr.msra.gmra.mxu1 %vm873_vm2, %v1304_v63 }
 0x369   : > { %v4441_v54 = vpop.eup %4440  ;;  %4212 = vmatpush3.msra.mxu1 %v4979_v29  ;;  %4213 = vmatprep.mubr.msk.f32.mxu1 %vm4539_vm1, %v4538_v22 }
 0x36a   : > { %v1478_v27 = vadd.f32 %v1477_v40, %v5041_v41  ;;  %v1651_v46 = vmul.f32 0.7, %v4441_v54  ;;  %3368 = vrot.lane.b32.xlu0 %v5077_v25, %s4540_s22  ;;  %4221 = vmatprep.subr.mxu1 %v4538_v22  ;;  %s4544_s22 = smov 16  }
 0x36b   : > { %v2336_v48 = vpop.xlane.xlu1 %2335 }
 0x36c   : > { %v1652_v58 = vmul.f32 %v5003_v0, %v1651_v46  ;;  %4448 = vrcp.f32 %v2336_v48  ;;  %4214 = vmatmul.mubr.msk.f32.vlgmr.msra.gmra.mxu1 %vm873_vm2, %v1478_v27 }
 0x36d   : > { %v4443_v49 = vpop.eup %4442  ;;  %4222 = vmatpush3.msra.mxu1 %v4812_v47  ;;  %4223 = vmatprep.mubr.msk.f32.mxu1 %vm4539_vm1, %v4538_v22 }
 0x36e   : > { %v1653_v29 = vadd.f32 %v1652_v58, %v1563_v44  ;;  %v1817_v41 = vmul.f32 0.7, %v4443_v49  ;;  %4231 = vmatprep.subr.mxu1 %v4538_v22 }
 0x36f   : > { %v2502_v1 = vpop.xlane.xlu1 %2501 }
 0x370   : > { %v1818_v15 = vmul.f32 %v5008_v6, %v1817_v41  ;;  %4450 = vrcp.f32 %v2502_v1  ;;  %4224 = vmatmul.mubr.msk.f32.vlgmr.msra.gmra.mxu1 %vm873_vm2, %v1653_v29 }
 0x371   : > { %v4445_v0 = vpop.eup %4444  ;;  %4232 = vmatpush3.msra.mxu1 %v4923_v37  ;;  %4233 = vmatprep.mubr.msk.f32.mxu1 %vm4539_vm1, %v4538_v22 }
 0x372   : > { %v1819_v47 = vadd.f32 %v1818_v15, %v1563_v44  ;;  %v1991_v52 = vmul.f32 0.7, %v4445_v0  ;;  %4241 = vmatprep.subr.mxu1 %v4538_v22 }
 0x373   : > { %v2676_v19 = vpop.xlane.xlu0 %2675 }
 0x374   : > { %v1992_v53 = vmul.f32 %v5013_v11, %v1991_v52  ;;  %4452 = vrcp.f32 %v2676_v19  ;;  %4234 = vmatmul.mubr.msk.f32.vlgmr.msra.gmra.mxu1 %vm873_vm2, %v1819_v47  ;;  %v3628_v19 = vld [vmem:[%s5300_s10 + $0x10] sm:$0xff] }
 0x375   : > { %v4447_v6 = vpop.eup %4446  ;;  %4242 = vmatpush3.msra.mxu1 %v4981_v31  ;;  %4243 = vmatprep.mubr.msk.f32.mxu1 %vm4539_vm1, %v4538_v22 }
 0x376   : > { %v1993_v37 = vadd.f32 %v1992_v53, %v1563_v44  ;;  %v2164_v30 = vmul.f32 0.7, %v4447_v6  ;;  %4251 = vmatprep.subr.mxu1 %v4538_v22  ;;  %v3627_v6 = vld [vmem:[%s5300_s10 + $0x8] sm:$0xff] }
 0x377   : > { %v2849_v28 = vpop.xlane.xlu1 %2848  ;;  %v2855_v16 = vpop.permute.xlu0 %2854 }
 0x378   : > { %v2165_v57 = vmul.f32 %v5018_v21, %v2164_v30  ;;  %4454 = vrcp.f32 %v2849_v28  ;;  %4244 = vmatmul.mubr.msk.f32.vlgmr.msra.gmra.mxu1 %vm873_vm2, %v1993_v37  ;;  %v3626_v30 = vld [vmem:[%s5300_s10] sm:$0xff] }
 0x379   : > { %v4449_v11 = vpop.eup %4448  ;;  %4252 = vmatpush3.msra.mxu1 %v5084_v4  ;;  %4253 = vmatprep.mubr.msk.f32.mxu1 %vm4539_vm1, %v4538_v22 }
 0x37a   : > { %v2166_v31 = vadd.f32 %v2165_v57, %v1563_v44  ;;  %v2338_v9 = vmul.f32 0.7, %v4449_v11  ;;  %4261 = vmatprep.subr.mxu1 %v4538_v22 }
 0x37b   : > { %v2682_v8 = vpop.permute.xlu1 %2681 }
 0x37c   : > { %v2339_v62 = vmul.f32 %v5022_v13, %v2338_v9  ;;  %4254 = vmatmul.mubr.msk.f32.vlgmr.msra.gmra.mxu1 %vm873_vm2, %v2166_v31 }
 0x37d   : > { %v4451_v38 = vpop.eup %4450  ;;  %4262 = vmatpush3.msra.mxu1 %v4967_v23  ;;  %4263 = vmatprep.mubr.msk.f32.mxu1 %vm4539_vm1, %v4538_v22 }
 0x37e   : > { %v2340_v21 = vadd.f32 %v2339_v62, %v2250_v60  ;;  %v2504_v2 = vmul.f32 0.7, %v4451_v38  ;;  %4271 = vmatprep.subr.mxu1 %v4538_v22 }
 0x380   : > { %v2505_v3 = vmul.f32 %v5026_v34, %v2504_v2  ;;  %4264 = vmatmul.mubr.msk.f32.vlgmr.msra.gmra.mxu1 %vm873_vm2, %v2340_v21 }
 0x381   : > { %v4453_v4 = vpop.eup %4452  ;;  %4272 = vmatpush3.msra.mxu1 %v5060_v24  ;;  %4273 = vmatprep.mubr.msk.f32.mxu1 %vm4539_vm1, %v4538_v22 }
 0x382   : > { %v2506_v13 = vadd.f32 %v2505_v3, %v2250_v60  ;;  %v2678_v43 = vmul.f32 0.7, %v4453_v4  ;;  %4281 = vmatprep.subr.mxu1 %v4538_v22 }
 0x384   : > { %v2679_v23 = vmul.f32 %v5037_v36, %v2678_v43  ;;  %4274 = vmatmul.mubr.msk.f32.vlgmr.msra.gmra.mxu1 %vm873_vm2, %v2506_v13 }
 0x385   : > { %v4455_v42 = vpop.eup %4454  ;;  %4282 = vmatpush3.msra.mxu1 %v2682_v8  ;;  %4283 = vmatprep.mubr.msk.f32.mxu1 %vm4539_vm1, %v4538_v22 }
 0x386   : > { %v2680_v34 = vadd.f32 %v2679_v23, %v2250_v60  ;;  %v2851_v12 = vmul.f32 0.7, %v4455_v42  ;;  %4291 = vmatprep.subr.mxu1 %v4538_v22 }
 0x388   : > { %v2852_v24 = vmul.f32 %v5043_v45, %v2851_v12  ;;  %4284 = vmatmul.mubr.msk.f32.vlgmr.msra.gmra.mxu1 %vm873_vm2, %v2680_v34 }
 0x389   : > { %4292 = vmatpush3.msra.mxu1 %v2855_v16  ;;  %4293 = vmatprep.mubr.msk.f32.mxu1 %vm4539_vm1, %v4538_v22 }
 0x38a   : > { %v2853_v36 = vadd.f32 %v2852_v24, %v2250_v60  ;;  %4301 = vmatprep.subr.mxu1 %v4538_v22 }
 0x38c   : > { %4294 = vmatmul.mubr.msk.f32.vlgmr.msra.gmra.mxu1 %vm873_vm2, %v2853_v36 }
 0x38d   : > { %4302 = vmatpush3.msra.mxu1 %v5077_v25  ;;  %4303 = vmatprep.mubr.msk.f32.mxu1 %vm4539_vm1, %v4538_v22 }
 0x38e   : > { %4311 = vmatprep.subr.mxu1 %v4538_v22 }
 0x3a8   : > { %v3023_v45 = vpop.xlane.xlu0 %3022 }
 0x3a9   : > { %4456 = vrcp.f32 %v3023_v45 }
 0x3ac   : > { %v3189_v10 = vpop.xlane.xlu1 %3188  ;;  %v3196_v50 = vpop.permute.xlu0 %3195 }
 0x3ad   : > { %4458 = vrcp.f32 %v3189_v10 }
 0x3b0   : > { %v1033_v51 = vpop.f32.mrf.mxu1 }
 0x3b1   : > { %1037 = vst.msk [vmem:[#allocation2] sm:$0xff] %vm873_vm2, %v1033_v51 }
 0x3b2   : > { %v4185_v14 = vpop.f32.mrf.mxu1 }
 0x3b6   : > { %v4457_v55 = vpop.eup %4456 }
 0x3b7   : > { %v3025_v20 = vmul.f32 0.7, %v4457_v55 }
 0x3b9   : > { %v3026_v26 = vmul.f32 %v5063_v33, %v3025_v20  ;;  %v3536_v33 = vpop.xlane.xlu1 %3535 }
 0x3ba   : > { %v4459_v25 = vpop.eup %4458  ;;  %4460 = vrcp.f32 %v3536_v33 }
 0x3bb   : > { %v3027_v59 = vadd.f32 %v3026_v26, %v2937_v18  ;;  %v3191_v32 = vmul.f32 0.7, %v4459_v25 }
 0x3bd   : > { %v3192_v63 = vmul.f32 %v5067_v5, %v3191_v32  ;;  %4304 = vmatmul.mubr.msk.f32.vlgmr.msra.gmra.mxu1 %vm873_vm2, %v3027_v59  ;;  %v3542_v49 = vpop.permute.xlu1 %3541 }
 0x3be   : > { %4312 = vmatpush3.msra.mxu1 %v3196_v50  ;;  %4313 = vmatprep.mubr.msk.f32.mxu1 %vm4539_vm1, %v4538_v22  ;;  %v4027_v50 = vld [vmem:[%s5301_s11] ss:$0 sm:$0xff] }
 0x3bf   : > { %v3193_v35 = vadd.f32 %v3192_v63, %v2937_v18  ;;  %4321 = vmatprep.subr.mxu1 %v4538_v22 }
 0x3c1   : > { %4314 = vmatmul.mubr.msk.f32.vlgmr.msra.gmra.mxu1 %vm873_vm2, %v3193_v35 }
 0x3c2   : > { %4323 = vmatprep.mubr.msk.f32.mxu1 %vm4539_vm1, %v4538_v22 }
 0x3c7   : > { %v4461_v40 = vpop.eup %4460 }
 0x3c8   : > { %v3538_v27 = vmul.f32 0.7, %v4461_v40 }
 0x3ca   : > { %v3539_v48 = vmul.f32 %v5071_v61, %v3538_v27  ;;  %v4473_v27 = vld [vmem:[%s4724_s28] sm:$0xff] }
 0x3cc   : > { %v3540_v29 = vadd.f32 %v3539_v48, %v2937_v18 }
 0x3dd   : > { %v3363_v39 = vpop.xlane.xlu0 %3362 }
 0x3de   : > { %4462 = vrcp.f32 %v3363_v39 }
 0x3e1   : > { %v3369_v5 = vpop.permute.xlu0 %3368 }
 0x3e2   : > { %4322 = vmatpush3.msra.mxu1 %v3369_v5  ;;  %v4472_v5 = vld [vmem:[%s4724_s28 + $0x8] sm:$0xff] }
 0x3e3   : > { %4331 = vmatprep.subr.mxu1 %v4538_v22 }
 0x3eb   : > { %v4463_v54 = vpop.eup %4462 }
 0x3ec   : > { %v3365_v44 = vmul.f32 0.7, %v4463_v54 }
 0x3ee   : > { %v3366_v46 = vmul.f32 %v5086_v7, %v3365_v44 }
 0x3f0   : > { %v3367_v58 = vadd.f32 %v3366_v46, %v2937_v18 }
 0x3f2   : > { %4324 = vmatmul.mubr.msk.f32.vlgmr.msra.gmra.mxu1 %vm873_vm2, %v3367_v58 }
 0x3f3   : > { %4332 = vmatpush3.msra.mxu1 %v3542_v49  ;;  %4333 = vmatprep.mubr.msk.f32.mxu1 %vm4539_vm1, %v4538_v22  ;;  %v3629_v22 = vld [vmem:[%s5300_s10 + $0x18] sm:$0xff] }
 0x3f4   : > { %4336 = vmatprep.subr.mxu0 %v3629_v22 }
 0x3f5   : > { %4337 = vmatpush3.msra.mxu0 %v3629_v22  ;;  %v4475_v22 = vld [vmem:[%s4724_s28 + $0x10] sm:$0xff] }
 0x3f6   : > { %4334 = vmatmul.mubr.msk.f32.vlgmr.msra.gmra.mxu1 %vm873_vm2, %v3540_v29  ;;  %4338 = vmatprep.subr.mxu0 %v3628_v19 }
 0x3f7   : > { %4339 = vmatpush3.msra.mxu0 %v3628_v19 }
 0x3f8   : > { %4340 = vmatprep.subr.mxu0 %v3627_v6 }
 0x3f9   : > { %4341 = vmatpush3.msra.mxu0 %v3627_v6 }
 0x3fa   : > { %4342 = vmatprep.subr.mxu0 %v3626_v30 }
 0x3fb   : > { %4343 = vmatpush3.msra.mxu0 %v3626_v30 }
 0x424   : > { %v1203_v41 = vpop.f32.mrf.mxu1 }
 0x425   : > { %1208 = vrot.lane.b32.xlu0 %v1203_v41, %s4543_s15 }
 0x426   : > { %v4195_v1 = vpop.f32.mrf.mxu1 }
 0x428   : > { %v1377_v15 = vpop.f32.mrf.mxu1 }
 0x429   : > { %1382 = vrot.lane.b32.xlu1 %v1377_v15, %s4544_s22 }
 0x42a   : > { %v4205_v61 = vpop.f32.mrf.mxu1 }
 0x42c   : > { %v1551_v7 = vpop.f32.mrf.mxu1 }
 0x42d   : > { %1556 = vrot.lane.b32.xlu1 %v1551_v7, %s4545_s26  ;;  %v4474_v7 = vld [vmem:[%s4724_s28 + $0x18] sm:$0xff] }
 0x42e   : > { %v4215_v0 = vpop.f32.mrf.mxu1 }
 0x430   : > { %v1723_v47 = vpop.f32.mrf.mxu1 }
 0x431   : > { %1727 = vst.msk [vmem:[#allocation2 + $0x8] sm:$0xff] %vm873_vm2, %v1723_v47 }
 0x432   : > { %v4225_v52 = vpop.f32.mrf.mxu1 }
 0x434   : > { %v1893_v53 = vpop.f32.mrf.mxu1 }
 0x435   : > { %1898 = vrot.lane.b32.xlu0 %v1893_v53, %s4543_s15 }
 0x436   : > { %v4235_v37 = vpop.f32.mrf.mxu1 }
 0x438   : > { %v2066_v56 = vpop.f32.mrf.mxu1 }
 0x439   : > { %2071 = vrot.lane.b32.xlu0 %v2066_v56, %s4544_s22 }
 0x43a   : > { %v4245_v28 = vpop.f32.mrf.mxu1 }
 0x43c   : > { %v2239_v57 = vpop.f32.mrf.mxu1 }
 0x43d   : > { %2244 = vrot.lane.b32.xlu1 %v2239_v57, %s4545_s26 }
 0x43e   : > { %v4255_v11 = vpop.f32.mrf.mxu1 }
 0x440   : > { %v2410_v31 = vpop.f32.mrf.mxu1 }
 0x441   : > { %2414 = vst.msk [vmem:[#allocation2 + $0x10] sm:$0xff] %vm873_vm2, %v2410_v31 }
 0x442   : > { %v4265_v60 = vpop.f32.mrf.mxu1 }
 0x444   : > { %v2580_v9 = vpop.f32.mrf.mxu1 }
 0x445   : > { %2585 = vrot.lane.b32.xlu0 %v2580_v9, %s4543_s15 }
 0x446   : > { %v4275_v62 = vpop.f32.mrf.mxu1 }
 0x448   : > { %v2753_v38 = vpop.f32.mrf.mxu1 }
 0x449   : > { %2758 = vrot.lane.b32.xlu1 %v2753_v38, %s4544_s22 }
 0x44a   : > { %v4285_v21 = vpop.f32.mrf.mxu1 }
 0x44c   : > { %v2926_v2 = vpop.f32.mrf.mxu1 }
 0x44d   : > { %2931 = vrot.lane.b32.xlu1 %v2926_v2, %s4545_s26 }
 0x44e   : > { %v4295_v3 = vpop.f32.mrf.mxu1 }
 0x47d   : > { %v3097_v4 = vpop.f32.mrf.mxu1 }
 0x47e   : > { %3101 = vst.msk [vmem:[#allocation2 + $0x18] sm:$0xff] %vm873_vm2, %v3097_v4  ;;  %v4032_v4 = vld [vmem:[%s5302_s12] ss:$0 sm:$0xff] }
 0x47f   : > { %v4305_v13 = vpop.f32.mrf.mxu1 }
 0x481   : > { %v3267_v43 = vpop.f32.mrf.mxu1 }
 0x482   : > { %3272 = vrot.lane.b32.xlu0 %v3267_v43, %s4543_s15  ;;  %v4033_v43 = vld [vmem:[%s5303_s13] ss:$0 sm:$0xff]  ;;  %s4035_s15 = sshll.u32 %s4646_s17, 7  ;;  %s4549_s17 = smov [#allocation3]  }
 0x483   : > { %v4315_v23 = vpop.f32.mrf.mxu1  ;;  %s5255_s20 = scalar_lea.hbm %s5304_s14, %s4035_s15 }
 0x497   : > { %v1209_v8 = vpop.permute.xlu0 %1208 }
 0x498   : > { %1212 = vst.msk [vmem:[#allocation2] sm:$0xff] %vm1211_vm3, %v1209_v8 }
 0x49b   : > { %v1383_v42 = vpop.permute.xlu1 %1382 }
 0x49c   : > { %1386 = vst.msk [vmem:[#allocation2] sm:$0xff] %vm1385_vm4, %v1383_v42 }
 0x49f   : > { %v1557_v34 = vpop.permute.xlu1 %1556 }
 0x4a0   : > { %1560 = vst.msk [vmem:[#allocation2] sm:$0xff] %vm1559_vm5, %v1557_v34 }
 0x4a7   : > { %v1899_v12 = vpop.permute.xlu0 %1898  ;;  %v3622_v24 = vld [vmem:[#allocation2] sm:$0xff] }
 0x4a8   : > { %1901 = vst.msk [vmem:[#allocation2 + $0x8] sm:$0xff] %vm1211_vm3, %v1899_v12  ;;  %4344 = vmatprep.mubr.msk.f32.mxu0 %vm557_vm0, %v3622_v24 }
 0x4ab   : > { %v2072_v16 = vpop.permute.xlu0 %2071 }
 0x4ac   : > { %2074 = vst.msk [vmem:[#allocation2 + $0x8] sm:$0xff] %vm1385_vm4, %v2072_v16 }
 0x4af   : > { %v2245_v36 = vpop.permute.xlu1 %2244 }
 0x4b0   : > { %2247 = vst.msk [vmem:[#allocation2 + $0x8] sm:$0xff] %vm1559_vm5, %v2245_v36 }
 0x4b2   : > { %v3440_v45 = vpop.f32.mrf.mxu1 }
 0x4b3   : > { %3445 = vrot.lane.b32.xlu0 %v3440_v45, %s4544_s22  ;;  %s509_s22 = scalar_lea.vmem [#allocation3], %s3952_s19 }
 0x4b4   : > { %v4325_v10 = vpop.f32.mrf.mxu1  ;;  %s3853_s28 = sshll.u32 %s509_s22, 4  ;;  %s3854_s28 = int_to_ptr.vmem [resolvable:$true] %s3853_s28 }
 0x4b6   : > { %v3613_v51 = vpop.f32.mrf.mxu1 }
 0x4b7   : > { %v2586_v14 = vpop.permute.xlu0 %2585  ;;  %3618 = vrot.lane.b32.xlu1 %v3613_v51, %s4545_s26  ;;  %v3623_v17 = vld [vmem:[#allocation2 + $0x8] sm:$0xff] }
 0x4b8   : > { %2588 = vst.msk [vmem:[#allocation2 + $0x10] sm:$0xff] %vm1211_vm3, %v2586_v14  ;;  %v4335_v55 = vpop.f32.mrf.mxu1  ;;  %4345 = vmatmul.mubr.msk.f32.vlgmr.msra.gmra.mxu0 %vm557_vm0, %v3623_v17 }
 0x4bb   : > { %v2759_v18 = vpop.permute.xlu1 %2758 }
 0x4bc   : > { %2761 = vst.msk [vmem:[#allocation2 + $0x10] sm:$0xff] %vm1385_vm4, %v2759_v18 }
 0x4bf   : > { %v2932_v20 = vpop.permute.xlu1 %2931 }
 0x4c0   : > { %2934 = vst.msk [vmem:[#allocation2 + $0x10] sm:$0xff] %vm1559_vm5, %v2932_v20 }
 0x4c7   : > { %v3624_v26 = vld [vmem:[#allocation2 + $0x10] sm:$0xff] }
 0x4c8   : > { %4347 = vmatprep.mubr.msk.f32.mxu0 %vm557_vm0, %v3624_v26 }
 0x4f4   : > { %v3273_v25 = vpop.permute.xlu0 %3272 }
 0x4f5   : > { %3275 = vst.msk [vmem:[#allocation2 + $0x18] sm:$0xff] %vm1211_vm3, %v3273_v25 }
 0x525   : > { %v3446_v59 = vpop.permute.xlu0 %3445 }
 0x526   : > { %3448 = vst.msk [vmem:[#allocation2 + $0x18] sm:$0xff] %vm1385_vm4, %v3446_v59 }
 0x529   : > { %v3619_v32 = vpop.permute.xlu1 %3618 }
 0x52a   : > { %3621 = vst.msk [vmem:[#allocation2 + $0x18] sm:$0xff] %vm1559_vm5, %v3619_v32 }
 0x531   : > { %v3625_v63 = vld [vmem:[#allocation2 + $0x18] sm:$0xff] }
 0x532   : > { %4348 = vmatmul.mubr.msk.f32.gmra.mxu0 %vm557_vm0, %v3625_v63 }
 0x578   : > { %v4346_v35 = vpop.f32.mrf.mxu0 }
 0x579   : > { %v3721_v33 = vadd.f32 %v4346_v35, %v4027_v50 }
 0x57a   : > { %v3715_v39 = vpop.f32.mrf.mxu0 }
 0x57b   : > { %v3735_v40 = vadd.f32 %v4472_v5, %v3721_v33  ;;  %v3716_v54 = vadd.f32 %v4027_v50, %v3715_v39 }
 0x57d   : > { %v5227_v44 = vadd.f32 %v4473_v27, %v3716_v54  ;;  %v3741_v46 = vsel %vm557_vm0, %v3735_v40, 0.0  ;;  %v3756_v49 = vmul.f32 %v3735_v40, %v3735_v40 }
 0x57e   : > { %3742 = vadd.xlane.f32.xlu1 %v3741_v46 }
 0x57f   : > { %v3738_v48 = vsel %vm557_vm0, %v5227_v44, 0.0  ;;  %v3755_v58 = vmul.f32 %v5227_v44, %v5227_v44  ;;  %v3762_v41 = vsel %vm557_vm0, %v3756_v49, 0.0 }
 0x580   : > { %3739 = vadd.xlane.f32.xlu0 %v3738_v48 }
 0x581   : > { %v3759_v29 = vsel %vm557_vm0, %v3755_v58, 0.0 }
 0x582   : > { %3760 = vadd.xlane.f32.xlu1 %v3759_v29 }
 0x584   : > { %3763 = vadd.xlane.f32.xlu0 %v3762_v41 }
 0x5f2   : > { %v4349_v1 = vpop.f32.mrf.mxu0 }
 0x5f3   : > { %v3731_v15 = vadd.f32 %v4349_v1, %v4027_v50 }
 0x5f4   : > { %v3725_v61 = vpop.f32.mrf.mxu0 }
 0x5f5   : > { %v3737_v0 = vadd.f32 %v4474_v7, %v3731_v15  ;;  %v3726_v47 = vadd.f32 %v4027_v50, %v3725_v61 }
 0x5f7   : > { %v3736_v52 = vadd.f32 %v4475_v22, %v3726_v47  ;;  %v3747_v19 = vsel %vm557_vm0, %v3737_v0, 0.0  ;;  %v3758_v30 = vmul.f32 %v3737_v0, %v3737_v0 }
 0x5f8   : > { %3748 = vadd.xlane.f32.xlu0 %v3747_v19 }
 0x5f9   : > { %v3757_v53 = vmul.f32 %v3736_v52, %v3736_v52  ;;  %v3744_v37 = vsel %vm557_vm0, %v3736_v52, 0.0  ;;  %v3768_v56 = vsel %vm557_vm0, %v3758_v30, 0.0 }
 0x5fb   : > { %v3765_v6 = vsel %vm557_vm0, %v3757_v53, 0.0 }
 0x5fc   : > { %3766 = vadd.xlane.f32.xlu1 %v3765_v6  ;;  %3745 = vadd.xlane.f32.xlu0 %v3744_v37 }
 0x600   : > { %3769 = vadd.xlane.f32.xlu0 %v3768_v56 }
 0x607   : > { %v3743_v28 = vpop.xlane.xlu1 %3742 }
 0x608   : > { %v3752_v11 = vmul.f32 0.03125, %v3743_v28 }
 0x609   : > { %v3740_v57 = vpop.xlane.xlu0 %3739 }
 0x60a   : > { %v3776_v60 = vmul.f32 %v3752_v11, %v3752_v11  ;;  %v3784_v21 = vsub.f32 %v3735_v40, %v3752_v11  ;;  %v3751_v40 = vmul.f32 0.03125, %v3740_v57 }
 0x60b   : > { %v3761_v8 = vpop.xlane.xlu1 %3760 }
 0x60c   : > { %v3775_v54 = vmul.f32 %v3751_v40, %v3751_v40  ;;  %v3771_v27 = vmul.f32 0.03125, %v3761_v8  ;;  %v3783_v49 = vsub.f32 %v5227_v44, %v3751_v40 }
 0x60d   : > { %v3764_v31 = vpop.xlane.xlu0 %3763 }
 0x60e   : > { %v3772_v9 = vmul.f32 0.03125, %v3764_v31  ;;  %v3779_v46 = vsub.f32 %v3771_v27, %v3775_v54 }
 0x610   : > { %v3780_v62 = vsub.f32 %v3772_v9, %v3776_v60  ;;  %v3787_v48 = vadd.f32 1e-05, %v3779_v46 }
 0x612   : > { %v3788_v38 = vadd.f32 1e-05, %v3780_v62 }
 0x614   : > { %4464 = vrsqrt.f32 %v3788_v38 }
 0x621   : > { %v4465_v2 = vpop.eup %4464 }
 0x622   : > { %v3796_v3 = vmul.f32 %v4465_v2, %v3784_v21 }
 0x624   : > { %v3807_v13 = vmul.f32 %v4032_v4, %v3796_v3 }
 0x626   : > { %v3818_v23 = vadd.f32 %v4033_v43, %v3807_v13 }
 0x628   : > { %3822 = vrot.lane.b32.xlu1 %v3818_v23, %s4546_s21  ;;  %s3840_s21 = scalar_lea.sflag [#allocation4], %s507_s27 }
 0x681   : > { %v3749_v42 = vpop.xlane.xlu0 %3748 }
 0x682   : > { %v3754_v24 = vmul.f32 0.03125, %v3749_v42 }
 0x684   : > { %v3778_v51 = vmul.f32 %v3754_v24, %v3754_v24  ;;  %v3786_v59 = vsub.f32 %v3737_v0, %v3754_v24 }
 0x685   : > { %v3746_v34 = vpop.xlane.xlu0 %3745  ;;  %v3767_v12 = vpop.xlane.xlu1 %3766 }
 0x686   : > { %v3753_v16 = vmul.f32 0.03125, %v3746_v34  ;;  %v3773_v45 = vmul.f32 0.03125, %v3767_v12 }
 0x688   : > { %v3777_v36 = vmul.f32 %v3753_v16, %v3753_v16  ;;  %v3785_v26 = vsub.f32 %v3736_v52, %v3753_v16 }
 0x689   : > { %v3770_v10 = vpop.xlane.xlu0 %3769 }
 0x68a   : > { %v3781_v14 = vsub.f32 %v3773_v45, %v3777_v36  ;;  %v3774_v17 = vmul.f32 0.03125, %v3770_v10 }
 0x68c   : > { %v3789_v55 = vadd.f32 1e-05, %v3781_v14  ;;  %v3782_v18 = vsub.f32 %v3774_v17, %v3778_v51 }
 0x68e   : > { %4466 = vrsqrt.f32 %v3789_v55  ;;  %v3790_v20 = vadd.f32 1e-05, %v3782_v18 }
 0x690   : > { %4468 = vrsqrt.f32 %v3790_v20 }
 0x691   : > { %4470 = vrsqrt.f32 %v3787_v48 }
 0x69a   : > { %v3823_v1 = vpop.permute.xlu1 %3822 }
 0x69b   : > { %v4467_v25 = vpop.eup %4466 }
 0x69c   : > { %v3797_v32 = vmul.f32 %v4467_v25, %v3785_v26 }
 0x69d   : > { %v4469_v63 = vpop.eup %4468 }
 0x69e   : > { %v3808_v50 = vmul.f32 %v4032_v4, %v3797_v32  ;;  %v3798_v35 = vmul.f32 %v4469_v63, %v3786_v59  ;;  %v4471_v58 = vpop.eup %4470 }
 0x69f   : > { %v3795_v29 = vmul.f32 %v4471_v58, %v3783_v49 }
 0x6a0   : > { %v3819_v33 = vadd.f32 %v4033_v43, %v3808_v50  ;;  %v3809_v39 = vmul.f32 %v4032_v4, %v3798_v35 }
 0x6a1   : > { %v3806_v41 = vmul.f32 %v4032_v4, %v3795_v29 }
 0x6a2   : > { %3826 = vrot.lane.b32.xlu0 %v3819_v33, %s4547_s0  ;;  %v3820_v5 = vadd.f32 %v4033_v43, %v3809_v39  ;;  %s4476_s0 = scalar_lea.vmem %s3854_s28, 128 }
 0x6a3   : > { %v3817_v15 = vadd.f32 %v4033_v43, %v3806_v41  ;;  %p4477_p11 = scmp.ne.s32.totalorder %s3854_s28, %s4476_s0 }
 0x6a4   : > { %3830 = vrot.lane.b32.xlu1 %v3820_v5, %s4548_s25  ;;  %s4480_s25 = sshll.u32 %s4549_s17, 4  ;;  %s4481_s25 = int_to_ptr.vmem [resolvable:$false] %s4480_s25 }
 0x6a5   : > { %v3833_v61 = vsel %vm557_vm0, %v3817_v15, %v3823_v1  ;;  %p4478_p12 = pnand %p4477_p11, %p4663_p5  ;;  %s4482_s19 = scalar_lea.vmem %s4481_s25, 256 }
 0x6a6   : > { %p4483_p0 = scmp.lt.s32.totalorder %s3854_s28, %s4481_s25  ;;  %p4484_p1 = scmp.lt.s32.totalorder %s4482_s19, %s4476_s0 }
 0x6a7   : > { %p4479_p13 = pneg %p4478_p12 }
 0x6a8   : > { %p4485_p2 = por %p4484_p1, %p4483_p0 }
 0x6aa   : > { %p4486_p3 = pnand %p4485_p2, %p4479_p13 }
 0x714   : > { %v3827_v7 = vpop.permute.xlu0 %3826 }
 0x715   : > { %v3835_v0 = vsel %vm3834_vm6, %v3833_v61, %v3827_v7 }
 0x716   : > { %v3831_v47 = vpop.permute.xlu1 %3830 }
 0x717   : > { %v3837_v44 = vsel %vm3836_vm7, %v3835_v0, %v3831_v47 }
 0x718   : > { %3838 = vst [vmem:[%s509_s22] sm:$0xff] %v3837_v44 }
 0x719   : > { %4489 = shalt.err (!%p4486_p3)
}
 0x71a   : > { %s4490_s15 = scalar_lea.hbm %s5255_s20, 128  ;;  %s4494_s26 = scalar_lea.hbm %s5304_s14, 256 }
 0x71b   : > { %p4491_p4 = scmp.ne.s32.totalorder %s5255_s20, %s4490_s15  ;;  %p4495_p9 = scmp.lt.s32.totalorder %s5255_s20, %s5304_s14 }
 0x71c   : > { %p4496_p10 = scmp.lt.s32.totalorder %s4494_s26, %s4490_s15 }
 0x71d   : > { %p4492_p7 = pnand %p4491_p4, %p4663_p5 }
 0x71e   : > { %p4497_p11 = por %p4496_p10, %p4495_p9 }
 0x71f   : > { %p4493_p8 = pneg %p4492_p7 }
 0x721   : > { %p4498_p12 = pnand %p4497_p11, %p4493_p8 }
 0x723   : > { %4501 = shalt.err (!%p4498_p12)
}
 0x724   : > { %4350 = dma.vmem_to_hbm [thread:$0]  (%p4663_p5), %s3854_s28, 128, %s5255_s20, %s3840_s21  }
 0x725 PF: > { %p4356_p13 = scmp.ge.s32.totalorder %s4536_s16, 2  ;;  %s3865_s0 = sand.u32 1, %s4524_s29  }
 0x726   : > { %s3866_s25 = scalar_lea.sflag [#allocation4], %s3865_s0 }
 0x727   : > { %p4353_p0 = pnand %p4356_p13, %p4667_p6 }
 0x729   : > { %p4354_p1 = pneg %p4353_p0 }
 0x72b   : > { %4519 = dma.done.wait (%p4354_p1), %s3866_s25, 128  }
 0x72c   : > { %4521 = vsyncadd (%p4354_p1), %s3866_s25, 4294967168  ;;  %s5315_s16 = sld [smem:[#allocation7_spill]]  ;;  %s5318_s29 = smov %s4528_s30 }
 0x72d   : > { %s5316_s19 = sld [smem:[#allocation6_spill]] }
 0x72e   : > { %s5317_s15 = sld [smem:[#allocation8_spill]] }
 0x732   : > { %p24_p2 = scmp.ge.s32.totalorder %s5315_s16, 4  }
 0x733   : > { %s5319_s30 = smov %s5316_s19 }
 0x734   :  { %26 = sbr.rel (!%p24_p2) target bundleno = 5 (0x5), region = 123 }
 0x739   :  { %3871 = vsyncpa [#allocation4], 1 }
 0x73a   :  { %3873 = vsyncpa [#allocation4 + $0x1], 1 }

</bundles_post_ra>
